<compile_context>
chip_gen: v6e
topology: v6e:2x2x1
jax: 0.10.0
libtpu: 0.0.40
codegen_flags: <defaults>
</compile_context>

<pallas_src>
import functools

import numpy as np
import jax
import jax.numpy as jnp
from jax.experimental import pallas as pl
from jax.experimental.pallas import tpu as pltpu


# --------------------------------------------------------------------------------------
# Stage 1: per-batch pooled phi^T / g projections (tiny kernel, grid=(B,))
# --------------------------------------------------------------------------------------
def _pool_proj_kernel(x_blk_ref, wph_ref, bph_ref, wg_ref, bg_ref, phi_t_ref, g_ref):
    # x_blk_ref block: (1, 4, Np, C) bf16 -- the 4 window-position slabs of the 2x2 max pool.
    # Unrolled running max over the slabs: same MXU work as one (4*Np, C) matmul, but the
    # live f32 intermediate is 4x smaller (review item).
    def pooled_proj(w_ref):
        m = jnp.dot(x_blk_ref[0, 0], w_ref[...], preferred_element_type=jnp.float32)
        for s in range(1, 4):
            m = jnp.maximum(
                m, jnp.dot(x_blk_ref[0, s], w_ref[...], preferred_element_type=jnp.float32))
        return m                                               # (Np, Ci) f32

    # bias is window-invariant, so adding it after the max is exact
    phi = pooled_proj(wph_ref) + bph_ref[...]                  # (Np, Ci)
    g = pooled_proj(wg_ref) + bg_ref[...]                      # (Np, Ci)
    phi_t_ref[0] = phi.T.astype(phi_t_ref.dtype)               # (Ci, Np) bf16, one XLU transpose
    g_ref[0] = g.astype(g_ref.dtype)                           # (Np, Ci) bf16


# --------------------------------------------------------------------------------------
# Stage 2: flash-style attention over query tiles (grid=(B, N//tq), both axes parallel)
# --------------------------------------------------------------------------------------
def _attn_kernel(x_q_ref, phi_t_ref, g_ref,
                 wth_ref, bth_ref, ww_ref, bw_ref, scale_ref, shift_ref,
                 z_ref, *maybe_nl_ref):
    xq = x_q_ref[0]                                            # (tq, C) f32 (exact residual path)

    # theta projection: bf16 MXU feed, f32 accumulate
    theta = jnp.dot(xq.astype(jnp.bfloat16), wth_ref[...],
                    preferred_element_type=jnp.float32) + bth_ref[...]       # (tq, Ci)

    # scores vs. all pooled keys: lane-dense (tq,Ci)@(Ci,Np), bf16 operands
    f = jnp.dot(theta.astype(jnp.bfloat16), phi_t_ref[0],
                preferred_element_type=jnp.float32)                          # (tq, Np)

    # softmax in f32; EXACT reciprocal so nl_map rows sum to 1 despite the bf16 score feed
    f_max = jnp.max(f, axis=-1, keepdims=True)
    p = jnp.exp(f - f_max)
    f_div = p * pl.reciprocal(jnp.sum(p, axis=-1, keepdims=True))            # (tq, Np)

    y = jnp.dot(f_div.astype(jnp.bfloat16), g_ref[0],
                preferred_element_type=jnp.float32)                          # (tq, Ci)

    wy = jnp.dot(y.astype(jnp.bfloat16), ww_ref[...],
                 preferred_element_type=jnp.float32) + bw_ref[...]           # (tq, C)
    wy = wy * scale_ref[...] + shift_ref[...]                  # folded eval-mode BatchNorm

    z_ref[0] = (wy + xq).astype(z_ref.dtype)
    if maybe_nl_ref:                                           # attention map only when requested
        maybe_nl_ref[0][0] = f_div.astype(maybe_nl_ref[0].dtype)


# --------------------------------------------------------------------------------------
# Per-generation VMEM / tile sizing
# --------------------------------------------------------------------------------------
def _tpu_vmem_capacity_bytes():
    # Trace-time hardware query; fall back to the most conservative (v7x per-TC) figure.
    try:
        return int(pltpu.get_tpu_info().vmem_capacity_bytes)
    except Exception:
        return 64 * 1024 * 1024


def _vmem_limit_bytes(capacity):
    # ~48 MiB on v7x (64 MiB per TC), ~96 MiB on v5e/v6e (128 MiB physical).
    return int(min(capacity * 3 // 4, 96 * 1024 * 1024))


def _choose_query_tile(N, C, Np, with_nl_map, nl_bytes, vmem_limit, capacity):
    # Largest sublane-aligned divisor of N whose per-tile footprint fits ~half the VMEM limit
    # (the other half is reserved for phi^T/g residents, weights and compiler temporaries).
    per_row = 2 * 2 * C * 4            # x_q in + z out, double-buffered, f32
    per_row += 3 * Np * 4              # live f / p / f_div intermediates (f32)
    if with_nl_map:
        per_row += 2 * Np * nl_bytes   # nl_map out tile, double-buffered
    budget = max(vmem_limit // 2, 1 << 20)
    cap_rows = 256 if capacity <= 64 * 1024 * 1024 else 1024   # v7x vs v5e/v6e
    cap = max(8, min(cap_rows, budget // max(per_row, 1), N))
    cand = [t for t in range(8, cap + 1, 8) if N % t == 0]
    return max(cand) if cand else N


# --------------------------------------------------------------------------------------
# Wrapper
# --------------------------------------------------------------------------------------
@functools.partial(jax.jit, static_argnames=("tq", "return_nl_map", "nl_map_dtype"))
def nonlocal_block_forward(x_nchw, params, *, tq=None, return_nl_map=False,
                           nl_map_dtype=jnp.float32):
    B, C, H, W = x_nchw.shape
    assert H % 2 == 0 and W % 2 == 0, "2x2 max-pool sub-sampling needs even spatial dims"
    Ci = params["wth"].shape[1]
    N = H * W
    Hp, Wp = H // 2, W // 2
    Np = Hp * Wp

    capacity = _tpu_vmem_capacity_bytes()
    vmem_limit = _vmem_limit_bytes(capacity)
    nl_bytes = np.dtype(nl_map_dtype).itemsize
    if tq is None:
        tq = _choose_query_tile(N, C, Np, return_nl_map, nl_bytes, vmem_limit, capacity)
    assert N % tq == 0 and tq % 8 == 0

    # ---- glue: NCHW -> channels-last ----
    x_nhwc = jnp.transpose(x_nchw, (0, 2, 3, 1)).astype(jnp.float32)
    x_q = x_nhwc.reshape(B, N, C)                                  # f32 (exact residual)
    # 2x2-window-blocked copy (bf16) for the pooled phi/g branch: (B, 4 slabs, Np, C)
    x_blk = (x_nhwc.reshape(B, Hp, 2, Wp, 2, C)
                    .transpose(0, 2, 4, 1, 3, 5)
                    .reshape(B, 4, Np, C)
                    .astype(jnp.bfloat16))

    # ---- weights: bf16 MXU feeds, f32 biases / BN affine ----
    wph = params["wph"].astype(jnp.bfloat16)
    bph = params["bph"].reshape(1, Ci).astype(jnp.float32)
    wg = params["wg"].astype(jnp.bfloat16)
    bg = params["bg"].reshape(1, Ci).astype(jnp.float32)
    wth = params["wth"].astype(jnp.bfloat16)
    bth = params["bth"].reshape(1, Ci).astype(jnp.float32)
    ww = params["ww"].astype(jnp.bfloat16)
    bw = params["bw"].reshape(1, C).astype(jnp.float32)

    # fold eval-mode BN into a per-channel affine
    eps = 1e-5
    scale_v = params["bn_gamma"] / jnp.sqrt(params["bn_var"] + eps)
    shift_v = params["bn_beta"] - params["bn_mean"] * scale_v
    scale = scale_v.reshape(1, C).astype(jnp.float32)
    shift = shift_v.reshape(1, C).astype(jnp.float32)

    cparams = lambda sem: pltpu.CompilerParams(
        dimension_semantics=sem, vmem_limit_bytes=vmem_limit)

    # ---- stage 1: pooled phi^T / g per batch element ----
    phi_t, g = pl.pallas_call(
        _pool_proj_kernel,
        out_shape=(jax.ShapeDtypeStruct((B, Ci, Np), jnp.bfloat16),
                   jax.ShapeDtypeStruct((B, Np, Ci), jnp.bfloat16)),
        grid=(B,),
        in_specs=[
            pl.BlockSpec((1, 4, Np, C), lambda b: (b, 0, 0, 0)),
            pl.BlockSpec(wph.shape, lambda b: (0, 0), pipeline_mode=pl.Buffered(1)),
            pl.BlockSpec(bph.shape, lambda b: (0, 0), pipeline_mode=pl.Buffered(1)),
            pl.BlockSpec(wg.shape, lambda b: (0, 0), pipeline_mode=pl.Buffered(1)),
            pl.BlockSpec(bg.shape, lambda b: (0, 0), pipeline_mode=pl.Buffered(1)),
        ],
        out_specs=(pl.BlockSpec((1, Ci, Np), lambda b: (b, 0, 0)),
                   pl.BlockSpec((1, Np, Ci), lambda b: (b, 0, 0))),
        compiler_params=cparams(("parallel",)),
    )(x_blk, wph, bph, wg, bg)

    # ---- stage 2: attention over query tiles (both axes parallel -> megacore-friendly) ----
    weights = (wth, bth, ww, bw, scale, shift)
    in_specs = [
        pl.BlockSpec((1, tq, C), lambda b, q: (b, q, 0)),      # query tile (f32)
        pl.BlockSpec((1, Ci, Np), lambda b, q: (b, 0, 0)),     # phi^T, per-batch resident (bf16)
        pl.BlockSpec((1, Np, Ci), lambda b, q: (b, 0, 0)),     # g,     per-batch resident (bf16)
    ] + [
        # constant-index weights: single-buffered (double-buffering only wastes VMEM)
        pl.BlockSpec(a.shape, lambda b, q: (0, 0), pipeline_mode=pl.Buffered(1))
        for a in weights
    ]

    if return_nl_map:
        out_shape = (jax.ShapeDtypeStruct((B, N, C), jnp.float32),
                     jax.ShapeDtypeStruct((B, N, Np), nl_map_dtype))
        out_specs = (pl.BlockSpec((1, tq, C), lambda b, q: (b, q, 0)),
                     pl.BlockSpec((1, tq, Np), lambda b, q: (b, q, 0)))
    else:
        out_shape = jax.ShapeDtypeStruct((B, N, C), jnp.float32)
        out_specs = pl.BlockSpec((1, tq, C), lambda b, q: (b, q, 0))

    outs = pl.pallas_call(
        _attn_kernel,
        out_shape=out_shape,
        grid=(B, N // tq),
        in_specs=in_specs,
        out_specs=out_specs,
        compiler_params=cparams(("parallel", "parallel")),
    )(x_q, phi_t, g, *weights)

    if return_nl_map:
        z_flat, nl_map = outs
        z_nchw = z_flat.reshape(B, H, W, C).transpose(0, 3, 1, 2)
        return z_nchw, nl_map
    z_flat = outs
    return z_flat.reshape(B, H, W, C).transpose(0, 3, 1, 2)


# ----------------------- pure-JAX reference (for validation) -----------------------
def reference_forward(x_nchw, params, *, match_kernel_quant=True):
    B, C, H, W = x_nchw.shape
    Ci = params["wth"].shape[1]
    xf = jnp.transpose(x_nchw, (0, 2, 3, 1)).reshape(B, H * W, C).astype(jnp.float32)

    def q(a):  # mirror the kernel's bf16 MXU feeds (accumulation stays f32)
        return a.astype(jnp.bfloat16).astype(jnp.float32) if match_kernel_quant else a

    theta = q(xf) @ q(params["wth"]) + params["bth"]
    phi_f = q(xf) @ q(params["wph"]) + params["bph"]
    g_f = q(xf) @ q(params["wg"]) + params["bg"]

    def pool(a):
        a = a.reshape(B, H // 2, 2, W // 2, 2, Ci)
        return a.max(axis=(2, 4)).reshape(B, (H // 2) * (W // 2), Ci)

    phi_p, g_p = q(pool(phi_f)), q(pool(g_f))      # kernel stores pooled phi/g in bf16
    f = jnp.einsum("bnc,bmc->bnm", q(theta), phi_p)
    f_div = jax.nn.softmax(f, axis=-1)
    y = jnp.einsum("bnm,bmc->bnc", q(f_div), g_p)

    eps = 1e-5
    scale = params["bn_gamma"] / jnp.sqrt(params["bn_var"] + eps)
    shift = params["bn_beta"] - params["bn_mean"] * scale
    wy = (q(y) @ q(params["ww"]) + params["bw"]) * scale + shift
    z = wy + xf
    return z.reshape(B, H, W, C).transpose(0, 3, 1, 2), f_div


def init_params(key, C, Ci):
    ks = jax.random.split(key, 8)

    def conv_init(k, fan_in, shape):
        bound = 1.0 / jnp.sqrt(jnp.float32(fan_in))
        return jax.random.uniform(k, shape, jnp.float32, -bound, bound)

    return dict(
        wg=conv_init(ks[0], C, (C, Ci)),   bg=conv_init(ks[1], C, (Ci,)),
        wth=conv_init(ks[2], C, (C, Ci)),  bth=conv_init(ks[3], C, (Ci,)),
        wph=conv_init(ks[4], C, (C, Ci)),  bph=conv_init(ks[5], C, (Ci,)),
        ww=conv_init(ks[6], Ci, (Ci, C)),  bw=conv_init(ks[7], Ci, (C,)),
        # BatchNorm2d after the W-conv: gamma, beta initialized to 0 per the module __init__
        bn_gamma=jnp.zeros((C,), jnp.float32),
        bn_beta=jnp.zeros((C,), jnp.float32),
        bn_mean=jnp.zeros((C,), jnp.float32),
        bn_var=jnp.ones((C,), jnp.float32),
    )


if __name__ == "__main__":
    key = jax.random.PRNGKey(0)
    kx, kp = jax.random.split(key)
    B, C, H, W = 2, 4, 16, 16
    Ci = max(C // 2, 1)   # inter_channels = in_channels // 2

    x = jax.random.normal(kx, (B, C, H, W), jnp.float32)
    params = init_params(kp, C, Ci)

    # Path 1 (default, fastest): z only -- no attention-map output stream at all.
    z_only = nonlocal_block_forward(x, params)
    jax.block_until_ready(z_only)

    # Path 2: z + f32 nl_map; tq=64 exercises the multi-tile query axis and per-batch phi/g reuse.
    z, nl_map = nonlocal_block_forward(x, params, tq=64, return_nl_map=True)
    jax.block_until_ready((z, nl_map))

    z_exp, nl_exp = reference_forward(x, params)
    assert z.shape == (B, C, H, W)
    assert nl_map.shape == (B, H * W, (H // 2) * (W // 2))
    assert jnp.allclose(z, z_exp, atol=1e-3, rtol=1e-3)
    assert jnp.allclose(z_only, z_exp, atol=1e-3, rtol=1e-3)
    assert jnp.allclose(nl_map, nl_exp, atol=1e-3, rtol=1e-3)

    # Path 3: non-trivial ("loaded") eval-mode BN statistics + bf16 nl_map output.
    k1, k2, k3, k4 = jax.random.split(jax.random.PRNGKey(1), 4)
    params2 = dict(params)
    params2["bn_gamma"] = 0.5 * jax.random.normal(k1, (C,), jnp.float32)
    params2["bn_beta"] = 0.5 * jax.random.normal(k2, (C,), jnp.float32)
    params2["bn_mean"] = 0.5 * jax.random.normal(k3, (C,), jnp.float32)
    params2["bn_var"] = jax.random.uniform(k4, (C,), jnp.float32, 0.5, 1.5)

    z2, nl2 = nonlocal_block_forward(x, params2, tq=128, return_nl_map=True,
                                     nl_map_dtype=jnp.bfloat16)
    jax.block_until_ready((z2, nl2))
    z2_exp, nl2_exp = reference_forward(x, params2)
    assert jnp.allclose(z2, z2_exp, atol=5e-3, rtol=5e-3)
    assert jnp.allclose(nl2.astype(jnp.float32), nl2_exp, atol=5e-3, rtol=5e-2)

    print("KERNEL_OK")
</pallas_src>

<mosaic_0001>
module attributes {stable_mosaic.version = 11 : i64} {
  func.func @_pool_proj_kernel(%arg0: i32, %arg1: memref<1x4x64x4xbf16, #tpu.memory_space<vmem>>, %arg2: memref<4x2xbf16, #tpu.memory_space<vmem>>, %arg3: memref<1x2xf32, #tpu.memory_space<vmem>>, %arg4: memref<4x2xbf16, #tpu.memory_space<vmem>>, %arg5: memref<1x2xf32, #tpu.memory_space<vmem>>, %arg6: memref<1x2x64xbf16, #tpu.memory_space<vmem>>, %arg7: memref<1x64x2xbf16, #tpu.memory_space<vmem>>) attributes {dimension_semantics = [#tpu.dimension_semantics<parallel>], iteration_bounds = array<i64: 2>, scalar_prefetch = 0 : i64, scratch_operands = 0 : i64, tpu.core_type = #tpu.core_type<tc>, window_params = [{transform_indices = @transform_0, window_bounds = array<i64: 1, 4, 64, 4>}, {pipeline_mode = #tpu.pipeline_mode<synchronous>, transform_indices = @transform_1, window_bounds = array<i64: 4, 2>}, {pipeline_mode = #tpu.pipeline_mode<synchronous>, transform_indices = @transform_2, window_bounds = array<i64: 1, 2>}, {pipeline_mode = #tpu.pipeline_mode<synchronous>, transform_indices = @transform_3, window_bounds = array<i64: 4, 2>}, {pipeline_mode = #tpu.pipeline_mode<synchronous>, transform_indices = @transform_4, window_bounds = array<i64: 1, 2>}, {transform_indices = @transform_5, window_bounds = array<i64: 1, 2, 64>}, {transform_indices = @transform_6, window_bounds = array<i64: 1, 64, 2>}]} {
    %c0 = arith.constant 0 : index
    %c0_0 = arith.constant 0 : index
    %c0_1 = arith.constant 0 : index
    %c0_2 = arith.constant 0 : index
    %0 = vector.load %arg1[%c0, %c0_0, %c0_1, %c0_2] : memref<1x4x64x4xbf16, #tpu.memory_space<vmem>>, vector<1x1x64x4xbf16>
    %1 = vector.shape_cast %0 : vector<1x1x64x4xbf16> to vector<64x4xbf16>
    %c0_3 = arith.constant 0 : index
    %c0_4 = arith.constant 0 : index
    %2 = vector.load %arg2[%c0_3, %c0_4] : memref<4x2xbf16, #tpu.memory_space<vmem>>, vector<4x2xbf16>
    %cst = arith.constant dense<0.000000e+00> : vector<64x2xf32>
    %3 = tpu.matmul %1, %2, %cst {dimension_numbers = #tpu.dot_dimension_numbers<[1], [0], [0], [1], [0, 0, 1, 1], [], []>} : vector<64x4xbf16>, vector<4x2xbf16>, vector<64x2xf32> -> vector<64x2xf32>
    %c0_5 = arith.constant 0 : index
    %c1 = arith.constant 1 : index
    %c0_6 = arith.constant 0 : index
    %c0_7 = arith.constant 0 : index
    %4 = vector.load %arg1[%c0_5, %c1, %c0_6, %c0_7] : memref<1x4x64x4xbf16, #tpu.memory_space<vmem>>, vector<1x1x64x4xbf16>
    %5 = vector.shape_cast %4 : vector<1x1x64x4xbf16> to vector<64x4xbf16>
    %c0_8 = arith.constant 0 : index
    %c0_9 = arith.constant 0 : index
    %6 = vector.load %arg2[%c0_8, %c0_9] : memref<4x2xbf16, #tpu.memory_space<vmem>>, vector<4x2xbf16>
    %cst_10 = arith.constant dense<0.000000e+00> : vector<64x2xf32>
    %7 = tpu.matmul %5, %6, %cst_10 {dimension_numbers = #tpu.dot_dimension_numbers<[1], [0], [0], [1], [0, 0, 1, 1], [], []>} : vector<64x4xbf16>, vector<4x2xbf16>, vector<64x2xf32> -> vector<64x2xf32>
    %8 = arith.maximumf %3, %7 : vector<64x2xf32>
    %c0_11 = arith.constant 0 : index
    %c2 = arith.constant 2 : index
    %c0_12 = arith.constant 0 : index
    %c0_13 = arith.constant 0 : index
    %9 = vector.load %arg1[%c0_11, %c2, %c0_12, %c0_13] : memref<1x4x64x4xbf16, #tpu.memory_space<vmem>>, vector<1x1x64x4xbf16>
    %10 = vector.shape_cast %9 : vector<1x1x64x4xbf16> to vector<64x4xbf16>
    %c0_14 = arith.constant 0 : index
    %c0_15 = arith.constant 0 : index
    %11 = vector.load %arg2[%c0_14, %c0_15] : memref<4x2xbf16, #tpu.memory_space<vmem>>, vector<4x2xbf16>
    %cst_16 = arith.constant dense<0.000000e+00> : vector<64x2xf32>
    %12 = tpu.matmul %10, %11, %cst_16 {dimension_numbers = #tpu.dot_dimension_numbers<[1], [0], [0], [1], [0, 0, 1, 1], [], []>} : vector<64x4xbf16>, vector<4x2xbf16>, vector<64x2xf32> -> vector<64x2xf32>
    %13 = arith.maximumf %8, %12 : vector<64x2xf32>
    %c0_17 = arith.constant 0 : index
    %c3 = arith.constant 3 : index
    %c0_18 = arith.constant 0 : index
    %c0_19 = arith.constant 0 : index
    %14 = vector.load %arg1[%c0_17, %c3, %c0_18, %c0_19] : memref<1x4x64x4xbf16, #tpu.memory_space<vmem>>, vector<1x1x64x4xbf16>
    %15 = vector.shape_cast %14 : vector<1x1x64x4xbf16> to vector<64x4xbf16>
    %c0_20 = arith.constant 0 : index
    %c0_21 = arith.constant 0 : index
    %16 = vector.load %arg2[%c0_20, %c0_21] : memref<4x2xbf16, #tpu.memory_space<vmem>>, vector<4x2xbf16>
    %cst_22 = arith.constant dense<0.000000e+00> : vector<64x2xf32>
    %17 = tpu.matmul %15, %16, %cst_22 {dimension_numbers = #tpu.dot_dimension_numbers<[1], [0], [0], [1], [0, 0, 1, 1], [], []>} : vector<64x4xbf16>, vector<4x2xbf16>, vector<64x2xf32> -> vector<64x2xf32>
    %18 = arith.maximumf %13, %17 : vector<64x2xf32>
    %c0_23 = arith.constant 0 : index
    %c0_24 = arith.constant 0 : index
    %19 = vector.load %arg3[%c0_23, %c0_24] : memref<1x2xf32, #tpu.memory_space<vmem>>, vector<1x2xf32>
    %20 = vector.broadcast %19 : vector<1x2xf32> to vector<64x2xf32>
    %21 = arith.addf %18, %20 : vector<64x2xf32>
    %c0_25 = arith.constant 0 : index
    %c0_26 = arith.constant 0 : index
    %c0_27 = arith.constant 0 : index
    %c0_28 = arith.constant 0 : index
    %22 = vector.load %arg1[%c0_25, %c0_26, %c0_27, %c0_28] : memref<1x4x64x4xbf16, #tpu.memory_space<vmem>>, vector<1x1x64x4xbf16>
    %23 = vector.shape_cast %22 : vector<1x1x64x4xbf16> to vector<64x4xbf16>
    %c0_29 = arith.constant 0 : index
    %c0_30 = arith.constant 0 : index
    %24 = vector.load %arg4[%c0_29, %c0_30] : memref<4x2xbf16, #tpu.memory_space<vmem>>, vector<4x2xbf16>
    %cst_31 = arith.constant dense<0.000000e+00> : vector<64x2xf32>
    %25 = tpu.matmul %23, %24, %cst_31 {dimension_numbers = #tpu.dot_dimension_numbers<[1], [0], [0], [1], [0, 0, 1, 1], [], []>} : vector<64x4xbf16>, vector<4x2xbf16>, vector<64x2xf32> -> vector<64x2xf32>
    %c0_32 = arith.constant 0 : index
    %c1_33 = arith.constant 1 : index
    %c0_34 = arith.constant 0 : index
    %c0_35 = arith.constant 0 : index
    %26 = vector.load %arg1[%c0_32, %c1_33, %c0_34, %c0_35] : memref<1x4x64x4xbf16, #tpu.memory_space<vmem>>, vector<1x1x64x4xbf16>
    %27 = vector.shape_cast %26 : vector<1x1x64x4xbf16> to vector<64x4xbf16>
    %c0_36 = arith.constant 0 : index
    %c0_37 = arith.constant 0 : index
    %28 = vector.load %arg4[%c0_36, %c0_37] : memref<4x2xbf16, #tpu.memory_space<vmem>>, vector<4x2xbf16>
    %cst_38 = arith.constant dense<0.000000e+00> : vector<64x2xf32>
    %29 = tpu.matmul %27, %28, %cst_38 {dimension_numbers = #tpu.dot_dimension_numbers<[1], [0], [0], [1], [0, 0, 1, 1], [], []>} : vector<64x4xbf16>, vector<4x2xbf16>, vector<64x2xf32> -> vector<64x2xf32>
    %30 = arith.maximumf %25, %29 : vector<64x2xf32>
    %c0_39 = arith.constant 0 : index
    %c2_40 = arith.constant 2 : index
    %c0_41 = arith.constant 0 : index
    %c0_42 = arith.constant 0 : index
    %31 = vector.load %arg1[%c0_39, %c2_40, %c0_41, %c0_42] : memref<1x4x64x4xbf16, #tpu.memory_space<vmem>>, vector<1x1x64x4xbf16>
    %32 = vector.shape_cast %31 : vector<1x1x64x4xbf16> to vector<64x4xbf16>
    %c0_43 = arith.constant 0 : index
    %c0_44 = arith.constant 0 : index
    %33 = vector.load %arg4[%c0_43, %c0_44] : memref<4x2xbf16, #tpu.memory_space<vmem>>, vector<4x2xbf16>
    %cst_45 = arith.constant dense<0.000000e+00> : vector<64x2xf32>
    %34 = tpu.matmul %32, %33, %cst_45 {dimension_numbers = #tpu.dot_dimension_numbers<[1], [0], [0], [1], [0, 0, 1, 1], [], []>} : vector<64x4xbf16>, vector<4x2xbf16>, vector<64x2xf32> -> vector<64x2xf32>
    %35 = arith.maximumf %30, %34 : vector<64x2xf32>
    %c0_46 = arith.constant 0 : index
    %c3_47 = arith.constant 3 : index
    %c0_48 = arith.constant 0 : index
    %c0_49 = arith.constant 0 : index
    %36 = vector.load %arg1[%c0_46, %c3_47, %c0_48, %c0_49] : memref<1x4x64x4xbf16, #tpu.memory_space<vmem>>, vector<1x1x64x4xbf16>
    %37 = vector.shape_cast %36 : vector<1x1x64x4xbf16> to vector<64x4xbf16>
    %c0_50 = arith.constant 0 : index
    %c0_51 = arith.constant 0 : index
    %38 = vector.load %arg4[%c0_50, %c0_51] : memref<4x2xbf16, #tpu.memory_space<vmem>>, vector<4x2xbf16>
    %cst_52 = arith.constant dense<0.000000e+00> : vector<64x2xf32>
    %39 = tpu.matmul %37, %38, %cst_52 {dimension_numbers = #tpu.dot_dimension_numbers<[1], [0], [0], [1], [0, 0, 1, 1], [], []>} : vector<64x4xbf16>, vector<4x2xbf16>, vector<64x2xf32> -> vector<64x2xf32>
    %40 = arith.maximumf %35, %39 : vector<64x2xf32>
    %c0_53 = arith.constant 0 : index
    %c0_54 = arith.constant 0 : index
    %41 = vector.load %arg5[%c0_53, %c0_54] : memref<1x2xf32, #tpu.memory_space<vmem>>, vector<1x2xf32>
    %42 = vector.broadcast %41 : vector<1x2xf32> to vector<64x2xf32>
    %43 = arith.addf %40, %42 : vector<64x2xf32>
    %44 = tpu.transpose %21, [1, 0] : vector<64x2xf32> -> vector<2x64xf32>
    %45 = arith.truncf %44 : vector<2x64xf32> to vector<2x64xbf16>
    %c0_55 = arith.constant 0 : index
    %c0_56 = arith.constant 0 : index
    %c0_57 = arith.constant 0 : index
    %46 = vector.load %arg6[%c0_55, %c0_56, %c0_57] : memref<1x2x64xbf16, #tpu.memory_space<vmem>>, vector<1x2x64xbf16>
    %47 = vector.shape_cast %46 : vector<1x2x64xbf16> to vector<2x64xbf16>
    %48 = vector.shape_cast %45 : vector<2x64xbf16> to vector<1x2x64xbf16>
    tpu.vector_store %arg6[%c0_55, %c0_56, %c0_57], %48 {strides = array<i32>} : memref<1x2x64xbf16, #tpu.memory_space<vmem>>, vector<1x2x64xbf16>,
    %49 = arith.truncf %43 : vector<64x2xf32> to vector<64x2xbf16>
    %c0_58 = arith.constant 0 : index
    %c0_59 = arith.constant 0 : index
    %c0_60 = arith.constant 0 : index
    %50 = vector.load %arg7[%c0_58, %c0_59, %c0_60] : memref<1x64x2xbf16, #tpu.memory_space<vmem>>, vector<1x64x2xbf16>
    %51 = vector.shape_cast %50 : vector<1x64x2xbf16> to vector<64x2xbf16>
    %52 = vector.shape_cast %49 : vector<64x2xbf16> to vector<1x64x2xbf16>
    tpu.vector_store %arg7[%c0_58, %c0_59, %c0_60], %52 {strides = array<i32>} : memref<1x64x2xbf16, #tpu.memory_space<vmem>>, vector<1x64x2xbf16>,
    return
  }
  func.func @transform_0(%arg0: i32) -> (i32, i32, i32, i32) {
    %c0_i32 = arith.constant 0 : i32
    %c0_i32_0 = arith.constant 0 : i32
    %c0_i32_1 = arith.constant 0 : i32
    %c0_i32_2 = arith.constant 0 : i32
    return %arg0, %c0_i32, %c0_i32_0, %c0_i32_1 : i32, i32, i32, i32
  }
  func.func @transform_1(%arg0: i32) -> (i32, i32) {
    %c0_i32 = arith.constant 0 : i32
    %c0_i32_0 = arith.constant 0 : i32
    %c0_i32_1 = arith.constant 0 : i32
    return %c0_i32, %c0_i32_0 : i32, i32
  }
  func.func @transform_2(%arg0: i32) -> (i32, i32) {
    %c0_i32 = arith.constant 0 : i32
    %c0_i32_0 = arith.constant 0 : i32
    %c0_i32_1 = arith.constant 0 : i32
    return %c0_i32, %c0_i32_0 : i32, i32
  }
  func.func @transform_3(%arg0: i32) -> (i32, i32) {
    %c0_i32 = arith.constant 0 : i32
    %c0_i32_0 = arith.constant 0 : i32
    %c0_i32_1 = arith.constant 0 : i32
    return %c0_i32, %c0_i32_0 : i32, i32
  }
  func.func @transform_4(%arg0: i32) -> (i32, i32) {
    %c0_i32 = arith.constant 0 : i32
    %c0_i32_0 = arith.constant 0 : i32
    %c0_i32_1 = arith.constant 0 : i32
    return %c0_i32, %c0_i32_0 : i32, i32
  }
  func.func @transform_5(%arg0: i32) -> (i32, i32, i32) {
    %c0_i32 = arith.constant 0 : i32
    %c0_i32_0 = arith.constant 0 : i32
    %c0_i32_1 = arith.constant 0 : i32
    return %arg0, %c0_i32, %c0_i32_0 : i32, i32, i32
  }
  func.func @transform_6(%arg0: i32) -> (i32, i32, i32) {
    %c0_i32 = arith.constant 0 : i32
    %c0_i32_0 = arith.constant 0 : i32
    %c0_i32_1 = arith.constant 0 : i32
    return %arg0, %c0_i32, %c0_i32_0 : i32, i32, i32
  }
}

module attributes {stable_mosaic.version = 11 : i64} {
  func.func @_attn_kernel(%arg0: i32, %arg1: i32, %arg2: memref<1x256x4xf32, #tpu.memory_space<vmem>>, %arg3: memref<1x2x64xbf16, #tpu.memory_space<vmem>>, %arg4: memref<1x64x2xbf16, #tpu.memory_space<vmem>>, %arg5: memref<4x2xbf16, #tpu.memory_space<vmem>>, %arg6: memref<1x2xf32, #tpu.memory_space<vmem>>, %arg7: memref<2x4xbf16, #tpu.memory_space<vmem>>, %arg8: memref<1x4xf32, #tpu.memory_space<vmem>>, %arg9: memref<1x4xf32, #tpu.memory_space<vmem>>, %arg10: memref<1x4xf32, #tpu.memory_space<vmem>>, %arg11: memref<1x256x4xf32, #tpu.memory_space<vmem>>) attributes {dimension_semantics = [#tpu.dimension_semantics<parallel>, #tpu.dimension_semantics<parallel>], iteration_bounds = array<i64: 2, 1>, scalar_prefetch = 0 : i64, scratch_operands = 0 : i64, tpu.core_type = #tpu.core_type<tc>, window_params = [{transform_indices = @transform_0, window_bounds = array<i64: 1, 256, 4>}, {transform_indices = @transform_1, window_bounds = array<i64: 1, 2, 64>}, {transform_indices = @transform_2, window_bounds = array<i64: 1, 64, 2>}, {pipeline_mode = #tpu.pipeline_mode<synchronous>, transform_indices = @transform_3, window_bounds = array<i64: 4, 2>}, {pipeline_mode = #tpu.pipeline_mode<synchronous>, transform_indices = @transform_4, window_bounds = array<i64: 1, 2>}, {pipeline_mode = #tpu.pipeline_mode<synchronous>, transform_indices = @transform_5, window_bounds = array<i64: 2, 4>}, {pipeline_mode = #tpu.pipeline_mode<synchronous>, transform_indices = @transform_6, window_bounds = array<i64: 1, 4>}, {pipeline_mode = #tpu.pipeline_mode<synchronous>, transform_indices = @transform_7, window_bounds = array<i64: 1, 4>}, {pipeline_mode = #tpu.pipeline_mode<synchronous>, transform_indices = @transform_8, window_bounds = array<i64: 1, 4>}, {transform_indices = @transform_9, window_bounds = array<i64: 1, 256, 4>}]} {
    %c0 = arith.constant 0 : index
    %c0_0 = arith.constant 0 : index
    %c0_1 = arith.constant 0 : index
    %0 = vector.load %arg2[%c0, %c0_0, %c0_1] : memref<1x256x4xf32, #tpu.memory_space<vmem>>, vector<1x256x4xf32>
    %1 = vector.shape_cast %0 : vector<1x256x4xf32> to vector<256x4xf32>
    %2 = arith.truncf %1 : vector<256x4xf32> to vector<256x4xbf16>
    %c0_2 = arith.constant 0 : index
    %c0_3 = arith.constant 0 : index
    %3 = vector.load %arg5[%c0_2, %c0_3] : memref<4x2xbf16, #tpu.memory_space<vmem>>, vector<4x2xbf16>
    %cst = arith.constant dense<0.000000e+00> : vector<256x2xf32>
    %4 = tpu.matmul %2, %3, %cst {dimension_numbers = #tpu.dot_dimension_numbers<[1], [0], [0], [1], [0, 0, 1, 1], [], []>} : vector<256x4xbf16>, vector<4x2xbf16>, vector<256x2xf32> -> vector<256x2xf32>
    %c0_4 = arith.constant 0 : index
    %c0_5 = arith.constant 0 : index
    %5 = vector.load %arg6[%c0_4, %c0_5] : memref<1x2xf32, #tpu.memory_space<vmem>>, vector<1x2xf32>
    %6 = vector.broadcast %5 : vector<1x2xf32> to vector<256x2xf32>
    %7 = arith.addf %4, %6 : vector<256x2xf32>
    %8 = arith.truncf %7 : vector<256x2xf32> to vector<256x2xbf16>
    %c0_6 = arith.constant 0 : index
    %c0_7 = arith.constant 0 : index
    %c0_8 = arith.constant 0 : index
    %9 = vector.load %arg3[%c0_6, %c0_7, %c0_8] : memref<1x2x64xbf16, #tpu.memory_space<vmem>>, vector<1x2x64xbf16>
    %10 = vector.shape_cast %9 : vector<1x2x64xbf16> to vector<2x64xbf16>
    %cst_9 = arith.constant dense<0.000000e+00> : vector<256x64xf32>
    %11 = tpu.matmul %8, %10, %cst_9 {dimension_numbers = #tpu.dot_dimension_numbers<[1], [0], [0], [1], [0, 0, 1, 1], [], []>} : vector<256x2xbf16>, vector<2x64xbf16>, vector<256x64xf32> -> vector<256x64xf32>
    %cst_10 = arith.constant dense<0xFF800000> : vector<256xf32>
    %12 = vector.multi_reduction <maximumf>, %11, %cst_10 [1] : vector<256x64xf32> to vector<256xf32>
    %13 = vector.shape_cast %12 : vector<256xf32> to vector<256x1xf32>
    %14 = vector.broadcast %13 : vector<256x1xf32> to vector<256x64xf32>
    %15 = arith.subf %11, %14 : vector<256x64xf32>
    %16 = math.exp %15 : vector<256x64xf32>
    %cst_11 = arith.constant dense<0.000000e+00> : vector<256xf32>
    %17 = vector.multi_reduction <add>, %16, %cst_11 [1] : vector<256x64xf32> to vector<256xf32>
    %18 = vector.shape_cast %17 : vector<256xf32> to vector<256x1xf32>
    %19 = tpu.reciprocal %18 : vector<256x1xf32> -> vector<256x1xf32>
    %20 = vector.broadcast %19 : vector<256x1xf32> to vector<256x64xf32>
    %21 = arith.mulf %16, %20 : vector<256x64xf32>
    %22 = arith.truncf %21 : vector<256x64xf32> to vector<256x64xbf16>
    %c0_12 = arith.constant 0 : index
    %c0_13 = arith.constant 0 : index
    %c0_14 = arith.constant 0 : index
    %23 = vector.load %arg4[%c0_12, %c0_13, %c0_14] : memref<1x64x2xbf16, #tpu.memory_space<vmem>>, vector<1x64x2xbf16>
    %24 = vector.shape_cast %23 : vector<1x64x2xbf16> to vector<64x2xbf16>
    %cst_15 = arith.constant dense<0.000000e+00> : vector<256x2xf32>
    %25 = tpu.matmul %22, %24, %cst_15 {dimension_numbers = #tpu.dot_dimension_numbers<[1], [0], [0], [1], [0, 0, 1, 1], [], []>} : vector<256x64xbf16>, vector<64x2xbf16>, vector<256x2xf32> -> vector<256x2xf32>
    %26 = arith.truncf %25 : vector<256x2xf32> to vector<256x2xbf16>
    %c0_16 = arith.constant 0 : index
    %c0_17 = arith.constant 0 : index
    %27 = vector.load %arg7[%c0_16, %c0_17] : memref<2x4xbf16, #tpu.memory_space<vmem>>, vector<2x4xbf16>
    %cst_18 = arith.constant dense<0.000000e+00> : vector<256x4xf32>
    %28 = tpu.matmul %26, %27, %cst_18 {dimension_numbers = #tpu.dot_dimension_numbers<[1], [0], [0], [1], [0, 0, 1, 1], [], []>} : vector<256x2xbf16>, vector<2x4xbf16>, vector<256x4xf32> -> vector<256x4xf32>
    %c0_19 = arith.constant 0 : index
    %c0_20 = arith.constant 0 : index
    %29 = vector.load %arg8[%c0_19, %c0_20] : memref<1x4xf32, #tpu.memory_space<vmem>>, vector<1x4xf32>
    %30 = vector.broadcast %29 : vector<1x4xf32> to vector<256x4xf32>
    %31 = arith.addf %28, %30 : vector<256x4xf32>
    %c0_21 = arith.constant 0 : index
    %c0_22 = arith.constant 0 : index
    %32 = vector.load %arg9[%c0_21, %c0_22] : memref<1x4xf32, #tpu.memory_space<vmem>>, vector<1x4xf32>
    %33 = vector.broadcast %32 : vector<1x4xf32> to vector<256x4xf32>
    %34 = arith.mulf %31, %33 : vector<256x4xf32>
    %c0_23 = arith.constant 0 : index
    %c0_24 = arith.constant 0 : index
    %35 = vector.load %arg10[%c0_23, %c0_24] : memref<1x4xf32, #tpu.memory_space<vmem>>, vector<1x4xf32>
    %36 = vector.broadcast %35 : vector<1x4xf32> to vector<256x4xf32>
    %37 = arith.addf %34, %36 : vector<256x4xf32>
    %38 = arith.addf %37, %1 : vector<256x4xf32>
    %c0_25 = arith.constant 0 : index
    %c0_26 = arith.constant 0 : index
    %c0_27 = arith.constant 0 : index
    %39 = vector.load %arg11[%c0_25, %c0_26, %c0_27] : memref<1x256x4xf32, #tpu.memory_space<vmem>>, vector<1x256x4xf32>
    %40 = vector.shape_cast %39 : vector<1x256x4xf32> to vector<256x4xf32>
    %41 = vector.shape_cast %38 : vector<256x4xf32> to vector<1x256x4xf32>
    tpu.vector_store %arg11[%c0_25, %c0_26, %c0_27], %41 {strides = array<i32>} : memref<1x256x4xf32, #tpu.memory_space<vmem>>, vector<1x256x4xf32>,
    return
  }
  func.func @transform_0(%arg0: i32, %arg1: i32) -> (i32, i32, i32) {
    %c0_i32 = arith.constant 0 : i32
    %c0_i32_0 = arith.constant 0 : i32
    return %arg0, %arg1, %c0_i32 : i32, i32, i32
  }
  func.func @transform_1(%arg0: i32, %arg1: i32) -> (i32, i32, i32) {
    %c0_i32 = arith.constant 0 : i32
    %c0_i32_0 = arith.constant 0 : i32
    %c0_i32_1 = arith.constant 0 : i32
    return %arg0, %c0_i32, %c0_i32_0 : i32, i32, i32
  }
  func.func @transform_2(%arg0: i32, %arg1: i32) -> (i32, i32, i32) {
    %c0_i32 = arith.constant 0 : i32
    %c0_i32_0 = arith.constant 0 : i32
    %c0_i32_1 = arith.constant 0 : i32
    return %arg0, %c0_i32, %c0_i32_0 : i32, i32, i32
  }
  func.func @transform_3(%arg0: i32, %arg1: i32) -> (i32, i32) {
    %c0_i32 = arith.constant 0 : i32
    %c0_i32_0 = arith.constant 0 : i32
    %c0_i32_1 = arith.constant 0 : i32
    return %c0_i32, %c0_i32_0 : i32, i32
  }
  func.func @transform_4(%arg0: i32, %arg1: i32) -> (i32, i32) {
    %c0_i32 = arith.constant 0 : i32
    %c0_i32_0 = arith.constant 0 : i32
    %c0_i32_1 = arith.constant 0 : i32
    return %c0_i32, %c0_i32_0 : i32, i32
  }
  func.func @transform_5(%arg0: i32, %arg1: i32) -> (i32, i32) {
    %c0_i32 = arith.constant 0 : i32
    %c0_i32_0 = arith.constant 0 : i32
    %c0_i32_1 = arith.constant 0 : i32
    return %c0_i32, %c0_i32_0 : i32, i32
  }
  func.func @transform_6(%arg0: i32, %arg1: i32) -> (i32, i32) {
    %c0_i32 = arith.constant 0 : i32
    %c0_i32_0 = arith.constant 0 : i32
    %c0_i32_1 = arith.constant 0 : i32
    return %c0_i32, %c0_i32_0 : i32, i32
  }
  func.func @transform_7(%arg0: i32, %arg1: i32) -> (i32, i32) {
    %c0_i32 = arith.constant 0 : i32
    %c0_i32_0 = arith.constant 0 : i32
    %c0_i32_1 = arith.constant 0 : i32
    return %c0_i32, %c0_i32_0 : i32, i32
  }
  func.func @transform_8(%arg0: i32, %arg1: i32) -> (i32, i32) {
    %c0_i32 = arith.constant 0 : i32
    %c0_i32_0 = arith.constant 0 : i32
    %c0_i32_1 = arith.constant 0 : i32
    return %c0_i32, %c0_i32_0 : i32, i32
  }
  func.func @transform_9(%arg0: i32, %arg1: i32) -> (i32, i32, i32) {
    %c0_i32 = arith.constant 0 : i32
    %c0_i32_0 = arith.constant 0 : i32
    return %arg0, %arg1, %c0_i32 : i32, i32, i32
  }
}

</mosaic_0001>

<bundles_post_ra>
// kernel: nonlocal_block_forward.2
= control target key start
LH: loop header
LB: loop body
LE: loop exit
PB: predicated region body
PF: predicated region fallthrough
CT: control target
= control target key end

     0   :  { %s1488_s21 = smov 0   ;;  %s1619_s0 = inlined_call_operand.vmem [shape: bf16[2,4,64,4], index: 0, kind: input, shape index: {}]   ;;  %s1620_s1 = inlined_call_operand.vmem [shape: bf16[4,2], index: 1, kind: input, shape index: {}]   ;;  %s1621_s2 = inlined_call_operand.vmem [shape: f32[1,2], index: 2, kind: input, shape index: {}]   ;;  %s1622_s3 = inlined_call_operand.vmem [shape: bf16[4,2], index: 3, kind: input, shape index: {}]   ;;  %s1623_s4 = inlined_call_operand.vmem [shape: f32[1,2], index: 4, kind: input, shape index: {}]   ;;  %s1624_s5 = inlined_call_operand.vmem [shape: bf16[2,2,64], index: 5, kind: output, shape index: {0}]   ;;  %s1625_s6 = inlined_call_operand.vmem [shape: bf16[2,64,2], index: 6, kind: output, shape index: {1}]  }
   0x1 LB: > { %s1189_s22 = sadd.s32 4294967295, %s1451_s21   ;;  %p1193_p0 = scmp.ge.s32.totalorder %s1451_s21, 1  ;;  %s1451_s21 = sphi %s1488_s21, %s17_s21  }
   0x2   : > { %p215_p1 = scmp.lt.s32.totalorder %s1451_s21, 3 }
   0x4   : > { %p216_p2 = pnand %p1193_p0, %p215_p1 }
   0x5   : > { %p248_p3 = scmp.lt.s32.totalorder (!%p216_p2), %s1189_s22, 1 }
   0x6   : > { %219 = sbr.rel (%p216_p2) target bundleno = 361 (0x169), region = 40 }
   0xb   : > { %v270_v0 = vld [vmem:[%s1620_s1] sm:$0x3]  ;;  %vm304_vm0 = vcmask 1041408   ;;  %s1627_s22 = smov (!%p248_p3, %s1189_s22), 1  ;;  %vm291_vm1 = vcmask 31744   ;;  %vm1100_vm2 = vcmask 11264  }
   0xc   : > { %1412 = vmatprep.subr.msk.bf16.mxu0 %vm304_vm0, %v270_v0  ;;  %v306_v1 = vsel %vm304_vm0, %v270_v0, 0  ;;  %1413 = vmatprep.subr.msk.bf16.mxu1 %vm304_vm0, %v270_v0  ;;  %s1282_s25 = sshll.u32 %s1627_s22, 7  ;;  %v730_v5 = vld [vmem:[%s1622_s3] sm:$0x3]  ;;  %s1283_s11 = sshll.u32 %s1627_s22, 5  ;;  %vm1066_vm3 = vcmask 516096  }
   0xd   : > { %1333 = vmatpush3.bf16.msra.mxu0 %v306_v1  ;;  %1343 = vmatpush3.bf16.msra.mxu1 %v306_v1  ;;  %s1510_s28 = scalar_lea.vmem %s1619_s0, %s1282_s25  ;;  %v732_v17 = vsel %vm304_vm0, %v730_v5, 0  ;;  %v1575_v48 = vld [vmem:[%s1621_s2] ss:$0 sm:$0xff]  ;;  %s1594_s14 = scalar_lea.vmem %s1625_s6, %s1283_s11 }
   0xe   : > { %1414 = vmatprep.subr.msk.bf16.mxu0 %vm304_vm0, %v270_v0  ;;  %1415 = vmatprep.subr.msk.bf16.mxu1 %vm304_vm0, %v270_v0  ;;  %v1429_v2 = vld [vmem:[%s1510_s28] sm:$0xff]   ;;  %v1431_v4 = vld [vmem:[%s1510_s28 + $0x8] sm:$0xff]   ;;  %v1433_v7 = vld [vmem:[%s1510_s28 + $0x10] sm:$0xff]   ;;  %s255_s17 = scalar_lea.vmem %s1624_s5, %s1627_s22 }
   0xf   : > { %v1430_v3 = vld [vmem:[%s1510_s28 + $0x20] sm:$0xff]   ;;  %1334 = vmatprep.mubr.msk.bf16.mxu0 %vm291_vm1, %v1429_v2  ;;  %v1432_v6 = vld [vmem:[%s1510_s28 + $0x28] sm:$0xff]   ;;  %v1434_v8 = vld [vmem:[%s1510_s28 + $0x30] sm:$0xff]  }
  0x10   : > { %1344 = vmatprep.mubr.msk.bf16.mxu1 %vm291_vm1, %v1430_v3  ;;  %1335 = vmatmul.mubr.msk.bf16.vlgmr.msra.gmra.mxu0 %vm291_vm1, %v1431_v4  ;;  %v1435_v9 = vld [vmem:[%s1510_s28 + $0x18] sm:$0xff]   ;;  %v1437_v11 = vld [vmem:[%s1510_s28 + $0x40] sm:$0xff]   ;;  %v1439_v13 = vld [vmem:[%s1510_s28 + $0x48] sm:$0xff]  }
  0x11   : > { %1345 = vmatmul.mubr.msk.bf16.vlgmr.msra.gmra.mxu1 %vm291_vm1, %v1432_v6  ;;  %1353 = vmatpush3.bf16.msra.mxu0 %v306_v1  ;;  %v1436_v10 = vld [vmem:[%s1510_s28 + $0x38] sm:$0xff]   ;;  %v1438_v12 = vld [vmem:[%s1510_s28 + $0x60] sm:$0xff]   ;;  %v1440_v14 = vld [vmem:[%s1510_s28 + $0x68] sm:$0xff]  }
  0x12   : > { %1363 = vmatpush3.bf16.msra.mxu1 %v306_v1  ;;  %1338 = vmatprep.mubr.msk.bf16.mxu0 %vm291_vm1, %v1433_v7  ;;  %v1441_v15 = vld [vmem:[%s1510_s28 + $0x50] sm:$0xff]   ;;  %v1442_v18 = vld [vmem:[%s1510_s28 + $0x58] sm:$0xff]  }
  0x13   : > { %1348 = vmatprep.mubr.msk.bf16.mxu1 %vm291_vm1, %v1434_v8  ;;  %1416 = vmatprep.subr.msk.bf16.mxu0 %vm304_vm0, %v730_v5  ;;  %v1443_v16 = vld [vmem:[%s1510_s28 + $0x70] sm:$0xff]   ;;  %v1444_v19 = vld [vmem:[%s1510_s28 + $0x78] sm:$0xff]  }
  0x14   : > { %1417 = vmatprep.subr.msk.bf16.mxu1 %vm304_vm0, %v730_v5 }
  0x18   : > { %1339 = vmatmul.mubr.msk.bf16.gmra.mxu0 %vm291_vm1, %v1435_v9 }
  0x19   : > { %1349 = vmatmul.mubr.msk.bf16.gmra.mxu1 %vm291_vm1, %v1436_v10  ;;  %1354 = vmatprep.mubr.msk.bf16.mxu0 %vm291_vm1, %v1437_v11 }
  0x1a   : > { %1364 = vmatprep.mubr.msk.bf16.mxu1 %vm291_vm1, %v1438_v12 }
  0x20   : > { %1355 = vmatmul.mubr.msk.bf16.vlgmr.msra.gmra.mxu0 %vm291_vm1, %v1439_v13 }
  0x21   : > { %1365 = vmatmul.mubr.msk.bf16.vlgmr.msra.gmra.mxu1 %vm291_vm1, %v1440_v14  ;;  %1358 = vmatprep.mubr.msk.bf16.mxu0 %vm291_vm1, %v1441_v15 }
  0x22   : > { %1368 = vmatprep.mubr.msk.bf16.mxu1 %vm291_vm1, %v1443_v16  ;;  %1373 = vmatpush3.bf16.msra.mxu0 %v732_v17 }
  0x23   : > { %1383 = vmatpush3.bf16.msra.mxu1 %v732_v17  ;;  %1418 = vmatprep.subr.msk.bf16.mxu0 %vm304_vm0, %v730_v5 }
  0x24   : > { %1419 = vmatprep.subr.msk.bf16.mxu1 %vm304_vm0, %v730_v5 }
  0x28   : > { %1359 = vmatmul.mubr.msk.bf16.gmra.mxu0 %vm291_vm1, %v1442_v18 }
  0x29   : > { %1369 = vmatmul.mubr.msk.bf16.gmra.mxu1 %vm291_vm1, %v1444_v19  ;;  %1374 = vmatprep.mubr.msk.bf16.mxu0 %vm291_vm1, %v1429_v2 }
  0x2a   : > { %1384 = vmatprep.mubr.msk.bf16.mxu1 %vm291_vm1, %v1430_v3 }
  0x30   : > { %1375 = vmatmul.mubr.msk.bf16.vlgmr.msra.gmra.mxu0 %vm291_vm1, %v1431_v4 }
  0x31   : > { %1385 = vmatmul.mubr.msk.bf16.vlgmr.msra.gmra.mxu1 %vm291_vm1, %v1432_v6  ;;  %1378 = vmatprep.mubr.msk.bf16.mxu0 %vm291_vm1, %v1433_v7 }
  0x32   : > { %1388 = vmatprep.mubr.msk.bf16.mxu1 %vm291_vm1, %v1434_v8  ;;  %1393 = vmatpush3.bf16.msra.mxu0 %v732_v17 }
  0x33   : > { %1403 = vmatpush3.bf16.msra.mxu1 %v732_v17 }
  0x38   : > { %1379 = vmatmul.mubr.msk.bf16.gmra.mxu0 %vm291_vm1, %v1435_v9 }
  0x39   : > { %1389 = vmatmul.mubr.msk.bf16.gmra.mxu1 %vm291_vm1, %v1436_v10  ;;  %1394 = vmatprep.mubr.msk.bf16.mxu0 %vm291_vm1, %v1437_v11 }
  0x3a   : > { %1404 = vmatprep.mubr.msk.bf16.mxu1 %vm291_vm1, %v1438_v12 }
  0x40   : > { %1395 = vmatmul.mubr.msk.bf16.vlgmr.msra.gmra.mxu0 %vm291_vm1, %v1439_v13 }
  0x41   : > { %1405 = vmatmul.mubr.msk.bf16.vlgmr.msra.gmra.mxu1 %vm291_vm1, %v1440_v14  ;;  %1398 = vmatprep.mubr.msk.bf16.mxu0 %vm291_vm1, %v1441_v15 }
  0x42   : > { %1408 = vmatprep.mubr.msk.bf16.mxu1 %vm291_vm1, %v1443_v16 }
  0x48   : > { %1399 = vmatmul.mubr.msk.bf16.gmra.mxu0 %vm291_vm1, %v1442_v18 }
  0x49   : > { %1409 = vmatmul.mubr.msk.bf16.gmra.mxu1 %vm291_vm1, %v1444_v19 }
  0xd0   : > { %v1336_v20 = vpop.f32.mrf.mxu0 }
  0xd1   : > { %v1346_v21 = vpop.f32.mrf.mxu1 }
  0xd2   : > { %v342_v22 = vpop.f32.mrf.mxu0  ;;  %v481_v43 = vmax.f32 %v1336_v20, %v1346_v21 }
  0xd3   : > { %v448_v23 = vpop.f32.mrf.mxu1 }
  0xd4   : > { %v1337_v24 = vpop.f32.mrf.mxu0  ;;  %v479_v37 = vmax.f32 %v342_v22, %v448_v23 }
  0xd5   : > { %v1347_v25 = vpop.f32.mrf.mxu1 }
  0xd6   : > { %v345_v26 = vpop.f32.mrf.mxu0  ;;  %v482_v54 = vmax.f32 %v1337_v24, %v1347_v25 }
  0xd7   : > { %v451_v27 = vpop.f32.mrf.mxu1 }
  0xd8   : > { %v1340_v28 = vpop.f32.mrf.mxu0  ;;  %v480_v44 = vmax.f32 %v345_v26, %v451_v27 }
  0xd9   : > { %v1350_v29 = vpop.f32.mrf.mxu1 }
  0xda   : > { %v358_v30 = vpop.f32.mrf.mxu0  ;;  %v485_v15 = vmax.f32 %v1340_v28, %v1350_v29 }
  0xdb   : > { %v464_v31 = vpop.f32.mrf.mxu1 }
  0xdc   : > { %v1568_v32 = vpop.f32.mrf.mxu0  ;;  %v483_v63 = vmax.f32 %v358_v30, %v464_v31 }
  0xdd   : > { %v1570_v33 = vpop.f32.mrf.mxu1 }
  0xde   : > { %v361_v34 = vpop.f32.mrf.mxu0  ;;  %v486_v23 = vmax.f32 %v1568_v32, %v1570_v33 }
  0xdf   : > { %v467_v35 = vpop.f32.mrf.mxu1 }
  0xe0   : > { %v1356_v36 = vpop.f32.mrf.mxu0  ;;  %v484_v7 = vmax.f32 %v361_v34, %v467_v35 }
  0xe1   : > { %v1366_v38 = vpop.f32.mrf.mxu1  ;;  %v595_v49 = vmax.f32 %v481_v43, %v1356_v36  ;;  %v1271_v43 = vld [vmem:[%s1623_s4] ss:$0 sm:$0xff] }
  0xe2   : > { %v562_v39 = vpop.f32.mrf.mxu0 }
  0xe3   : > { %v593_v40 = vmax.f32 %v479_v37, %v562_v39  ;;  %v676_v41 = vpop.f32.mrf.mxu1  ;;  %v709_v58 = vmax.f32 %v595_v49, %v1366_v38 }
  0xe4   : > { %v1357_v42 = vpop.f32.mrf.mxu0 }
  0xe5   : > { %v707_v45 = vmax.f32 %v593_v40, %v676_v41  ;;  %v1367_v46 = vpop.f32.mrf.mxu1  ;;  %v596_v59 = vmax.f32 %v482_v54, %v1357_v42  ;;  %v724_v5 = vadd.f32 %v1575_v48, %v709_v58 }
  0xe6   : > { %v565_v47 = vpop.f32.mrf.mxu0 }
  0xe7   : > { %v594_v50 = vmax.f32 %v480_v44, %v565_v47  ;;  %v679_v51 = vpop.f32.mrf.mxu1  ;;  %v722_v52 = vadd.f32 %v1575_v48, %v707_v45  ;;  %v710_v2 = vmax.f32 %v596_v59, %v1367_v46 }
  0xe8   : > { %v1360_v53 = vpop.f32.mrf.mxu0 }
  0xe9   : > { %v708_v55 = vmax.f32 %v594_v50, %v679_v51  ;;  %1033 = vxpose.xlu0.b32.start [1/8] (short) (narrow) %v722_v52, 8  ;;  %v1370_v56 = vpop.f32.mrf.mxu1  ;;  %v725_v12 = vadd.f32 %v1575_v48, %v710_v2  ;;  %v599_v18 = vmax.f32 %v485_v15, %v1360_v53 }
  0xea   : > { %v578_v57 = vpop.f32.mrf.mxu0 }
  0xeb   : > { %v692_v60 = vpop.f32.mrf.mxu1  ;;  %v723_v61 = vadd.f32 %v1575_v48, %v708_v55  ;;  %v597_v3 = vmax.f32 %v483_v63, %v578_v57  ;;  %v713_v26 = vmax.f32 %v599_v18, %v1370_v56 }
  0xec   : > { %v1361_v62 = vpop.f32.mrf.mxu0 }
  0xed   : > { %1034 = vxpose.xlu0.b32.cont [2/8] (short) (narrow) %v723_v61, 8  ;;  %v1371_v0 = vpop.f32.mrf.mxu1  ;;  %v711_v10 = vmax.f32 %v597_v3, %v692_v60  ;;  %v600_v27 = vmax.f32 %v486_v23, %v1361_v62  ;;  %v728_v37 = vadd.f32 %v1575_v48, %v713_v26 }
  0xee   : > { %v581_v1 = vpop.f32.mrf.mxu0 }
  0xef   : > { %v695_v4 = vpop.f32.mrf.mxu1  ;;  %v598_v11 = vmax.f32 %v484_v7, %v581_v1  ;;  %v726_v20 = vadd.f32 %v1575_v48, %v711_v10  ;;  %v714_v36 = vmax.f32 %v600_v27, %v1371_v0 }
  0xf0   : > { %v1376_v6 = vpop.f32.mrf.mxu0 }
  0xf1   : > { %1035 = vxpose.xlu0.b32.cont [3/8] (short) (narrow) %v724_v5, 8  ;;  %v1386_v8 = vpop.f32.mrf.mxu1  ;;  %v712_v19 = vmax.f32 %v598_v11, %v695_v4  ;;  %v729_v44 = vadd.f32 %v1575_v48, %v714_v36 }
  0xf2   : > { %v768_v9 = vpop.f32.mrf.mxu0  ;;  %v866_v31 = vmax.f32 %v1376_v6, %v1386_v8 }
  0xf3   : > { %v833_v13 = vpop.f32.mrf.mxu1  ;;  %v727_v30 = vadd.f32 %v1575_v48, %v712_v19 }
  0xf4   : > { %v1377_v14 = vpop.f32.mrf.mxu0  ;;  %v864_v38 = vmax.f32 %v768_v9, %v833_v13 }
  0xf5   : > { %1036 = vxpose.xlu0.b32.cont [4/8] (short) (narrow) %v725_v12, 8  ;;  %v1387_v16 = vpop.f32.mrf.mxu1 }
  0xf6   : > { %v771_v17 = vpop.f32.mrf.mxu0  ;;  %v867_v33 = vmax.f32 %v1377_v14, %v1387_v16 }
  0xf7   : > { %v836_v21 = vpop.f32.mrf.mxu1 }
  0xf8   : > { %v1380_v22 = vpop.f32.mrf.mxu0  ;;  %v865_v45 = vmax.f32 %v771_v17, %v836_v21 }
  0xf9   : > { %1037 = vxpose.xlu0.b32.cont [5/8] (short) (narrow) %v726_v20, 8  ;;  %v1390_v24 = vpop.f32.mrf.mxu1 }
  0xfa   : > { %v784_v25 = vpop.f32.mrf.mxu0  ;;  %v870_v51 = vmax.f32 %v1380_v22, %v1390_v24 }
  0xfb   : > { %v849_v28 = vpop.f32.mrf.mxu1 }
  0xfc   : > { %v1381_v29 = vpop.f32.mrf.mxu0  ;;  %v868_v56 = vmax.f32 %v784_v25, %v849_v28 }
  0xfd   : > { %1038 = vxpose.xlu0.b32.cont [6/8] (short) (narrow) %v727_v30, 8  ;;  %v1391_v34 = vpop.f32.mrf.mxu1 }
  0xfe   : > { %v787_v35 = vpop.f32.mrf.mxu0  ;;  %v871_v62 = vmax.f32 %v1381_v29, %v1391_v34 }
  0xff   : > { %v852_v39 = vpop.f32.mrf.mxu1 }
 0x100   : > { %v1396_v32 = vpop.f32.mrf.mxu0  ;;  %v869_v5 = vmax.f32 %v787_v35, %v852_v39 }
 0x101   : > { %1039 = vxpose.xlu0.b32.cont [7/8] (short) (narrow) %v728_v37, 8  ;;  %v939_v40 = vmax.f32 %v866_v31, %v1396_v32  ;;  %v1406_v41 = vpop.f32.mrf.mxu1 }
 0x102   : > { %v906_v42 = vpop.f32.mrf.mxu0 }
 0x103   : > { %v937_v46 = vmax.f32 %v864_v38, %v906_v42  ;;  %v1012_v47 = vmax.f32 %v939_v40, %v1406_v41  ;;  %v979_v49 = vpop.f32.mrf.mxu1 }
 0x104   : > { %v1397_v50 = vpop.f32.mrf.mxu0 }
 0x105   : > { %1040 = vxpose.xlu0.b32.end [8/8] (short) (narrow) %v729_v44, 8  ;;  %v1027_v52 = vadd.f32 %v1271_v43, %v1012_v47  ;;  %v940_v53 = vmax.f32 %v867_v33, %v1397_v50  ;;  %v1010_v54 = vmax.f32 %v937_v46, %v979_v49  ;;  %v1407_v55 = vpop.f32.mrf.mxu1 }
 0x106   : > { %v909_v48 = vpop.f32.mrf.mxu0 }
 0x107   : > { %v1286_v57 = vpack.c.bf16 %v1027_v52, %v1027_v52  ;;  %v1025_v58 = vadd.f32 %v1271_v43, %v1010_v54  ;;  %v938_v59 = vmax.f32 %v865_v45, %v909_v48  ;;  %v1013_v60 = vmax.f32 %v940_v53, %v1407_v55  ;;  %v982_v61 = vpop.f32.mrf.mxu1 }
 0x108   : > { %v1400_v63 = vpop.f32.mrf.mxu0 }
 0x109   : > { %1103 = vst.msk [vmem:[%s1594_s14 + $0x8] sm:$0xf] %vm1100_vm2, %v1286_v57  ;;  %v1284_v0 = vpack.c.bf16 %v1025_v58, %v1025_v58  ;;  %v1028_v1 = vadd.f32 %v1271_v43, %v1013_v60  ;;  %v943_v2 = vmax.f32 %v870_v51, %v1400_v63  ;;  %v1011_v3 = vmax.f32 %v938_v59, %v982_v61  ;;  %v1410_v4 = vpop.f32.mrf.mxu1 }
 0x10a   : > { %v922_v6 = vpop.f32.mrf.mxu0 }
 0x10b   : > { %1101 = vst.msk [vmem:[%s1594_s14] sm:$0xf] %vm1100_vm2, %v1284_v0  ;;  %v1287_v7 = vpack.c.bf16 %v1028_v1, %v1028_v1  ;;  %v1026_v8 = vadd.f32 %v1271_v43, %v1011_v3  ;;  %v941_v9 = vmax.f32 %v868_v56, %v922_v6  ;;  %v1016_v10 = vmax.f32 %v943_v2, %v1410_v4  ;;  %v995_v11 = vpop.f32.mrf.mxu1 }
 0x10c   : > { %v1401_v12 = vpop.f32.mrf.mxu0 }
 0x10d   : > { %1104 = vst.msk [vmem:[%s1594_s14 + $0xc] sm:$0xf] %vm1100_vm2, %v1287_v7  ;;  %v1285_v13 = vpack.c.bf16 %v1026_v8, %v1026_v8  ;;  %v1031_v14 = vadd.f32 %v1271_v43, %v1016_v10  ;;  %v944_v15 = vmax.f32 %v871_v62, %v1401_v12  ;;  %v1014_v16 = vmax.f32 %v941_v9, %v995_v11  ;;  %v1411_v17 = vpop.f32.mrf.mxu1 }
 0x10e   : > { %v925_v18 = vpop.f32.mrf.mxu0 }
 0x10f   : > { %1102 = vst.msk [vmem:[%s1594_s14 + $0x4] sm:$0xf] %vm1100_vm2, %v1285_v13  ;;  %v1290_v19 = vpack.c.bf16 %v1031_v14, %v1031_v14  ;;  %v1029_v20 = vadd.f32 %v1271_v43, %v1014_v16  ;;  %v942_v21 = vmax.f32 %v869_v5, %v925_v18  ;;  %v1017_v22 = vmax.f32 %v944_v15, %v1411_v17  ;;  %v998_v23 = vpop.f32.mrf.mxu1 }
 0x111   : > { %1107 = vst.msk [vmem:[%s1594_s14 + $0x18] sm:$0xf] %vm1100_vm2, %v1290_v19  ;;  %v1288_v24 = vpack.c.bf16 %v1029_v20, %v1029_v20  ;;  %v1032_v25 = vadd.f32 %v1271_v43, %v1017_v22  ;;  %v1015_v26 = vmax.f32 %v942_v21, %v998_v23 }
 0x113   : > { %1105 = vst.msk [vmem:[%s1594_s14 + $0x10] sm:$0xf] %vm1100_vm2, %v1288_v24  ;;  %v1291_v27 = vpack.c.bf16 %v1032_v25, %v1032_v25  ;;  %v1030_v30 = vadd.f32 %v1271_v43, %v1015_v26 }
 0x115   : > { %1108 = vst.msk [vmem:[%s1594_s14 + $0x1c] sm:$0xf] %vm1100_vm2, %v1291_v27  ;;  %v1289_v28 = vpack.c.bf16 %v1030_v30, %v1030_v30 }
 0x117   : > { %1106 = vst.msk [vmem:[%s1594_s14 + $0x14] sm:$0xf] %vm1100_vm2, %v1289_v28 }
 0x165   : > { %v1049_v29 = vpop.trf.xlu0 }
 0x166   : > { %v1065_v31 = vpack.c.bf16 %v1049_v29, %v1049_v29 }
 0x168   : > { %1067 = vst.msk [vmem:[%s255_s17] sm:$0x1] %vm1066_vm3, %v1065_v31 }
 0x169 PF: > { %s17_s21 = sadd.s32 1, %s1451_s21  }
 0x16a   : > { %p14_p4 = scmp.ge.s32.totalorder %s17_s21, 4  }
 0x16c   :  { %16 = sbr.rel (!%p14_p4) target bundleno = 1 (0x1), region = 85 }

// kernel: nonlocal_block_forward.3
= control target key start
LH: loop header
LB: loop body
LE: loop exit
PB: predicated region body
PF: predicated region fallthrough
CT: control target
= control target key end

     0   :  { %s2570_s30 = smov 0   ;;  %s2572_s10 = smov 0   ;;  %s3298_s0 = inlined_call_operand.vmem [shape: f32[2,256,4], index: 0, kind: input, shape index: {}]   ;;  %s3299_s1 = inlined_call_operand.vmem [shape: bf16[2,2,64], index: 1, kind: input, shape index: {}]   ;;  %s3300_s2 = inlined_call_operand.vmem [shape: bf16[2,64,2], index: 2, kind: input, shape index: {}]   ;;  %s3301_s3 = inlined_call_operand.vmem [shape: bf16[4,2], index: 3, kind: input, shape index: {}]   ;;  %s3302_s4 = inlined_call_operand.vmem [shape: f32[1,2], index: 4, kind: input, shape index: {}]   ;;  %s3303_s5 = inlined_call_operand.vmem [shape: bf16[2,4], index: 5, kind: input, shape index: {}]   ;;  %s3304_s6 = inlined_call_operand.vmem [shape: f32[1,4], index: 6, kind: input, shape index: {}]   ;;  %s3305_s7 = inlined_call_operand.vmem [shape: f32[1,4], index: 7, kind: input, shape index: {}]   ;;  %s3306_s8 = inlined_call_operand.vmem [shape: f32[1,4], index: 8, kind: input, shape index: {}]   ;;  %s3307_s9 = inlined_call_operand.vmem [shape: f32[2,256,4], index: 9, kind: output, shape index: {}]  }
   0x1   :  { %s2574_s11 = smov 0  }
   0x2 LB: > { %s31_s12 = sadd.s32 1, %s2514_s10  ;;  %p2008_p0 = scmp.ge.s32.totalorder %s2518_s11, 1  ;;  %s2518_s11 = sphi %s2574_s11, %s19_s11   ;;  %s2514_s10 = sphi %s2572_s10, %s3309_s10   ;;  %s2510_s30 = sphi %s2570_s30, %s3308_s30  }
   0x3   : > { %p33_p1 = scmp.ge.s32.totalorder %s31_s12, 2  ;;  %p326_p2 = scmp.lt.s32.totalorder %s2518_s11, 3 }
   0x5   : > { %s3311_s12 = smov (%p33_p1, %s31_s12), 0  ;;  %p327_p3 = pnand %p2008_p0, %p326_p2 }
   0x6   : > { %p379_p4 = scmp.lt.s32.totalorder (!%p327_p3), %s2510_s30, 1 }
   0x7   : > { %330 = sbr.rel (%p327_p3) target bundleno = 1207 (0x4b7), region = 56 }
   0xc   : > { %v455_v0 = vld [vmem:[%s3301_s3] sm:$0x3]  ;;  %vm512_vm0 = vcmask 1041408   ;;  %s3313_s30 = smov (!%p379_p4, %s2510_s30), 1  ;;  %vm463_vm1 = vcmask 31744   ;;  %vm743_vm2 = vcmask 1040384  }
   0xd   : > { %2305 = vmatprep.subr.msk.bf16.mxu0 %vm512_vm0, %v455_v0  ;;  %v514_v1 = vsel %vm512_vm0, %v455_v0, 0  ;;  %s2089_s15 = sshll.u32 %s3313_s30, 8  ;;  %s390_s21 = scalar_lea.vmem %s3299_s1, %s3313_s30  ;;  %v2658_v55 = vld [vmem:[%s3302_s4] ss:$0 sm:$0xff]  ;;  %vm694_vm3 = vcmask 15360   ;;  %vm908_vm4 = vcmask 523264  }
   0xe   : > { %2164 = vmatpush3.bf16.msra.mxu0 %v514_v1  ;;  %s2599_s18 = scalar_lea.vmem %s3298_s0, %s2089_s15  ;;  %v693_v50 = vld [vmem:[%s390_s21] sm:$0x1]  ;;  %s2090_s24 = sshll.u32 %s3313_s30, 5 }
   0xf   : > { %v407_v2 = vld [vmem:[%s2599_s18] sm:$0xff]  ;;  %v408_v3 = vld [vmem:[%s2599_s18 + $0x8] sm:$0xff]  ;;  %v409_v4 = vld [vmem:[%s2599_s18 + $0x10] sm:$0xff]  ;;  %2306 = vmatprep.subr.msk.bf16.mxu1 %vm743_vm2, %v693_v50  ;;  %v745_v51 = vsel %vm743_vm2, %v693_v50, 0  ;;  %s2840_s27 = scalar_lea.vmem %s3300_s2, %s2090_s24  ;;  %s3101_s23 = scalar_lea.vmem %s3307_s9, %s2089_s15 }
  0x10   : > { %v439_v5 = vpack.c.bf16 %v408_v3, %v407_v2  ;;  %v410_v6 = vld [vmem:[%s2599_s18 + $0x18] sm:$0xff]  ;;  %v411_v7 = vld [vmem:[%s2599_s18 + $0x20] sm:$0xff]  ;;  %v412_v8 = vld [vmem:[%s2599_s18 + $0x28] sm:$0xff]  ;;  %2198 = vmatpush3.bf16.msra.mxu1 %v745_v51 }
  0x11   : > { %v440_v9 = vpack.c.bf16 %v410_v6, %v409_v4  ;;  %v441_v10 = vpack.c.bf16 %v412_v8, %v411_v7  ;;  %v413_v11 = vld [vmem:[%s2599_s18 + $0x30] sm:$0xff]  ;;  %v414_v12 = vld [vmem:[%s2599_s18 + $0x38] sm:$0xff]  ;;  %v415_v13 = vld [vmem:[%s2599_s18 + $0x40] sm:$0xff] }
  0x12   : > { %2165 = vmatprep.mubr.msk.bf16.mxu0 %vm463_vm1, %v439_v5  ;;  %v416_v14 = vld [vmem:[%s2599_s18 + $0x48] sm:$0xff]  ;;  %v442_v15 = vpack.c.bf16 %v414_v12, %v413_v11  ;;  %v417_v17 = vld [vmem:[%s2599_s18 + $0x50] sm:$0xff]  ;;  %v418_v18 = vld [vmem:[%s2599_s18 + $0x58] sm:$0xff] }
  0x13   : > { %2166 = vmatmul.mubr.msk.bf16.vlgmr.msra.gmra.mxu0 %vm463_vm1, %v440_v9  ;;  %v443_v16 = vpack.c.bf16 %v416_v14, %v415_v13  ;;  %v419_v19 = vld [vmem:[%s2599_s18 + $0x60] sm:$0xff]  ;;  %v420_v20 = vld [vmem:[%s2599_s18 + $0x68] sm:$0xff]  ;;  %v444_v21 = vpack.c.bf16 %v418_v18, %v417_v17  ;;  %v421_v23 = vld [vmem:[%s2599_s18 + $0x70] sm:$0xff] }
  0x14   : > { %2169 = vmatprep.mubr.msk.bf16.mxu0 %vm463_vm1, %v441_v10  ;;  %v445_v22 = vpack.c.bf16 %v420_v20, %v419_v19  ;;  %v422_v24 = vld [vmem:[%s2599_s18 + $0x78] sm:$0xff]  ;;  %v423_v25 = vld [vmem:[%s2599_s18 + $0x80] sm:$0xff]  ;;  %v424_v26 = vld [vmem:[%s2599_s18 + $0x88] sm:$0xff] }
  0x15   : > { %v446_v27 = vpack.c.bf16 %v422_v24, %v421_v23  ;;  %v447_v28 = vpack.c.bf16 %v424_v26, %v423_v25  ;;  %v425_v29 = vld [vmem:[%s2599_s18 + $0x90] sm:$0xff]  ;;  %v426_v30 = vld [vmem:[%s2599_s18 + $0x98] sm:$0xff]  ;;  %v427_v31 = vld [vmem:[%s2599_s18 + $0xa0] sm:$0xff] }
  0x16   : > { %v428_v32 = vld [vmem:[%s2599_s18 + $0xa8] sm:$0xff]  ;;  %v448_v33 = vpack.c.bf16 %v426_v30, %v425_v29  ;;  %v429_v35 = vld [vmem:[%s2599_s18 + $0xb0] sm:$0xff]  ;;  %v430_v36 = vld [vmem:[%s2599_s18 + $0xb8] sm:$0xff] }
  0x17   : > { %v449_v34 = vpack.c.bf16 %v428_v32, %v427_v31  ;;  %v431_v37 = vld [vmem:[%s2599_s18 + $0xc0] sm:$0xff]  ;;  %v432_v38 = vld [vmem:[%s2599_s18 + $0xc8] sm:$0xff]  ;;  %v450_v39 = vpack.c.bf16 %v430_v36, %v429_v35  ;;  %v433_v41 = vld [vmem:[%s2599_s18 + $0xd0] sm:$0xff] }
  0x18   : > { %v451_v40 = vpack.c.bf16 %v432_v38, %v431_v37  ;;  %v434_v42 = vld [vmem:[%s2599_s18 + $0xd8] sm:$0xff]  ;;  %v435_v43 = vld [vmem:[%s2599_s18 + $0xe0] sm:$0xff]  ;;  %v436_v44 = vld [vmem:[%s2599_s18 + $0xe8] sm:$0xff] }
  0x19   : > { %v452_v45 = vpack.c.bf16 %v434_v42, %v433_v41  ;;  %v453_v46 = vpack.c.bf16 %v436_v44, %v435_v43  ;;  %v437_v47 = vld [vmem:[%s2599_s18 + $0xf0] sm:$0xff]  ;;  %v438_v48 = vld [vmem:[%s2599_s18 + $0xf8] sm:$0xff] }
  0x1a   : > { %v454_v49 = vpack.c.bf16 %v438_v48, %v437_v47 }
  0x1b   : > { %2170 = vmatmul.mubr.msk.bf16.gmra.mxu0 %vm463_vm1, %v442_v15 }
  0x1c   : > { %2173 = vmatprep.mubr.msk.bf16.mxu0 %vm463_vm1, %v443_v16 }
  0x23   : > { %2174 = vmatmul.mubr.msk.bf16.gmra.mxu0 %vm463_vm1, %v444_v21 }
  0x24   : > { %2177 = vmatprep.mubr.msk.bf16.mxu0 %vm463_vm1, %v445_v22 }
  0x2b   : > { %2178 = vmatmul.mubr.msk.bf16.gmra.mxu0 %vm463_vm1, %v446_v27 }
  0x2c   : > { %2181 = vmatprep.mubr.msk.bf16.mxu0 %vm463_vm1, %v447_v28 }
  0x33   : > { %2182 = vmatmul.mubr.msk.bf16.gmra.mxu0 %vm463_vm1, %v448_v33 }
  0x34   : > { %2185 = vmatprep.mubr.msk.bf16.mxu0 %vm463_vm1, %v449_v34 }
  0x3b   : > { %2186 = vmatmul.mubr.msk.bf16.gmra.mxu0 %vm463_vm1, %v450_v39 }
  0x3c   : > { %2189 = vmatprep.mubr.msk.bf16.mxu0 %vm463_vm1, %v451_v40 }
  0x43   : > { %2190 = vmatmul.mubr.msk.bf16.gmra.mxu0 %vm463_vm1, %v452_v45 }
  0x44   : > { %2193 = vmatprep.mubr.msk.bf16.mxu0 %vm463_vm1, %v453_v46 }
  0x4b   : > { %2194 = vmatmul.mubr.msk.bf16.gmra.mxu0 %vm463_vm1, %v454_v49 }
  0xd3   : > { %v2167_v52 = vpop.f32.mrf.mxu0 }
  0xd4   : > { %v559_v60 = vadd.f32 %v2167_v52, %v2658_v55 }
  0xd5   : > { %v550_v53 = vpop.f32.mrf.mxu0 }
  0xd6   : > { %v551_v58 = vadd.f32 %v2658_v55, %v550_v53 }
  0xd7   : > { %v2168_v54 = vpop.f32.mrf.mxu0 }
  0xd8   : > { %v562_v56 = vadd.f32 %v2168_v54, %v2658_v55 }
  0xd9   : > { %v553_v57 = vpop.f32.mrf.mxu0 }
  0xda   : > { %v554_v59 = vadd.f32 %v2658_v55, %v553_v57  ;;  %v678_v63 = vpack.c.bf16 %v562_v56, %v559_v60 }
  0xdb   : > { %v2171_v61 = vpop.f32.mrf.mxu0 }
  0xdc   : > { %v677_v62 = vpack.c.bf16 %v554_v59, %v551_v58  ;;  %v575_v6 = vadd.f32 %v2171_v61, %v2658_v55 }
  0xdd   : > { %v566_v0 = vpop.f32.mrf.mxu0 }
  0xde   : > { %2199 = vmatprep.mubr.msk.bf16.mxu1 %vm694_vm3, %v677_v62  ;;  %v567_v4 = vadd.f32 %v2658_v55, %v566_v0 }
  0xdf   : > { %v2172_v1 = vpop.f32.mrf.mxu0  ;;  %2200 = vmatmul.mubr.msk.bf16.vlgmr.msra.gmra.mxu1 %vm694_vm3, %v678_v63 }
  0xe0   : > { %v578_v2 = vadd.f32 %v2172_v1, %v2658_v55 }
  0xe1   : > { %v569_v3 = vpop.f32.mrf.mxu0 }
  0xe2   : > { %v570_v5 = vadd.f32 %v2658_v55, %v569_v3  ;;  %v680_v9 = vpack.c.bf16 %v578_v2, %v575_v6 }
  0xe3   : > { %v2175_v7 = vpop.f32.mrf.mxu0 }
  0xe4   : > { %v679_v8 = vpack.c.bf16 %v570_v5, %v567_v4  ;;  %v591_v16 = vadd.f32 %v2175_v7, %v2658_v55 }
  0xe5   : > { %v582_v10 = vpop.f32.mrf.mxu0 }
  0xe6   : > { %2203 = vmatprep.mubr.msk.bf16.mxu1 %vm694_vm3, %v679_v8  ;;  %v583_v14 = vadd.f32 %v2658_v55, %v582_v10 }
  0xe7   : > { %v2176_v11 = vpop.f32.mrf.mxu0  ;;  %2204 = vmatmul.mubr.msk.bf16.gmra.mxu1 %vm694_vm3, %v680_v9 }
  0xe8   : > { %v594_v12 = vadd.f32 %v2176_v11, %v2658_v55 }
  0xe9   : > { %v585_v13 = vpop.f32.mrf.mxu0 }
  0xea   : > { %v586_v15 = vadd.f32 %v2658_v55, %v585_v13  ;;  %v682_v19 = vpack.c.bf16 %v594_v12, %v591_v16 }
  0xeb   : > { %v2179_v17 = vpop.f32.mrf.mxu0 }
  0xec   : > { %v681_v18 = vpack.c.bf16 %v586_v15, %v583_v14  ;;  %v607_v26 = vadd.f32 %v2179_v17, %v2658_v55 }
  0xed   : > { %v598_v20 = vpop.f32.mrf.mxu0 }
  0xee   : > { %2207 = vmatprep.mubr.msk.bf16.mxu1 %vm694_vm3, %v681_v18  ;;  %v599_v24 = vadd.f32 %v2658_v55, %v598_v20 }
  0xef   : > { %v2180_v21 = vpop.f32.mrf.mxu0  ;;  %2208 = vmatmul.mubr.msk.bf16.gmra.mxu1 %vm694_vm3, %v682_v19 }
  0xf0   : > { %v610_v22 = vadd.f32 %v2180_v21, %v2658_v55 }
  0xf1   : > { %v601_v23 = vpop.f32.mrf.mxu0 }
  0xf2   : > { %v602_v25 = vadd.f32 %v2658_v55, %v601_v23  ;;  %v684_v29 = vpack.c.bf16 %v610_v22, %v607_v26 }
  0xf3   : > { %v2183_v27 = vpop.f32.mrf.mxu0 }
  0xf4   : > { %v683_v28 = vpack.c.bf16 %v602_v25, %v599_v24  ;;  %v623_v36 = vadd.f32 %v2183_v27, %v2658_v55 }
  0xf5   : > { %v614_v30 = vpop.f32.mrf.mxu0 }
  0xf6   : > { %2211 = vmatprep.mubr.msk.bf16.mxu1 %vm694_vm3, %v683_v28  ;;  %v615_v34 = vadd.f32 %v2658_v55, %v614_v30 }
  0xf7   : > { %v2184_v31 = vpop.f32.mrf.mxu0  ;;  %2212 = vmatmul.mubr.msk.bf16.gmra.mxu1 %vm694_vm3, %v684_v29 }
  0xf8   : > { %v626_v32 = vadd.f32 %v2184_v31, %v2658_v55 }
  0xf9   : > { %v617_v33 = vpop.f32.mrf.mxu0 }
  0xfa   : > { %v618_v35 = vadd.f32 %v2658_v55, %v617_v33  ;;  %v686_v39 = vpack.c.bf16 %v626_v32, %v623_v36 }
  0xfb   : > { %v2187_v37 = vpop.f32.mrf.mxu0 }
  0xfc   : > { %v685_v38 = vpack.c.bf16 %v618_v35, %v615_v34  ;;  %v639_v46 = vadd.f32 %v2187_v37, %v2658_v55 }
  0xfd   : > { %v630_v40 = vpop.f32.mrf.mxu0 }
  0xfe   : > { %2215 = vmatprep.mubr.msk.bf16.mxu1 %vm694_vm3, %v685_v38  ;;  %v631_v44 = vadd.f32 %v2658_v55, %v630_v40 }
  0xff   : > { %v2188_v41 = vpop.f32.mrf.mxu0  ;;  %2216 = vmatmul.mubr.msk.bf16.gmra.mxu1 %vm694_vm3, %v686_v39 }
 0x100   : > { %v642_v42 = vadd.f32 %v2188_v41, %v2658_v55 }
 0x101   : > { %v633_v43 = vpop.f32.mrf.mxu0 }
 0x102   : > { %v634_v45 = vadd.f32 %v2658_v55, %v633_v43  ;;  %v688_v49 = vpack.c.bf16 %v642_v42, %v639_v46 }
 0x103   : > { %v2191_v47 = vpop.f32.mrf.mxu0 }
 0x104   : > { %v687_v48 = vpack.c.bf16 %v634_v45, %v631_v44  ;;  %v655_v57 = vadd.f32 %v2191_v47, %v2658_v55 }
 0x105   : > { %v646_v50 = vpop.f32.mrf.mxu0 }
 0x106   : > { %2219 = vmatprep.mubr.msk.bf16.mxu1 %vm694_vm3, %v687_v48  ;;  %v647_v54 = vadd.f32 %v2658_v55, %v646_v50 }
 0x107   : > { %v2192_v51 = vpop.f32.mrf.mxu0  ;;  %2220 = vmatmul.mubr.msk.bf16.gmra.mxu1 %vm694_vm3, %v688_v49 }
 0x108   : > { %v658_v52 = vadd.f32 %v2192_v51, %v2658_v55 }
 0x109   : > { %v649_v53 = vpop.f32.mrf.mxu0 }
 0x10a   : > { %v650_v56 = vadd.f32 %v2658_v55, %v649_v53  ;;  %v690_v60 = vpack.c.bf16 %v658_v52, %v655_v57 }
 0x10b   : > { %v2195_v58 = vpop.f32.mrf.mxu0 }
 0x10c   : > { %v689_v59 = vpack.c.bf16 %v650_v56, %v647_v54  ;;  %v671_v3 = vadd.f32 %v2195_v58, %v2658_v55 }
 0x10d   : > { %v662_v61 = vpop.f32.mrf.mxu0 }
 0x10e   : > { %2223 = vmatprep.mubr.msk.bf16.mxu1 %vm694_vm3, %v689_v59  ;;  %v663_v1 = vadd.f32 %v2658_v55, %v662_v61 }
 0x10f   : > { %v2196_v62 = vpop.f32.mrf.mxu0  ;;  %2224 = vmatmul.mubr.msk.bf16.gmra.mxu1 %vm694_vm3, %v690_v60 }
 0x110   : > { %v674_v63 = vadd.f32 %v2196_v62, %v2658_v55 }
 0x111   : > { %v665_v0 = vpop.f32.mrf.mxu0 }
 0x112   : > { %v666_v2 = vadd.f32 %v2658_v55, %v665_v0  ;;  %v692_v5 = vpack.c.bf16 %v674_v63, %v671_v3 }
 0x114   : > { %v691_v4 = vpack.c.bf16 %v666_v2, %v663_v1 }
 0x116   : > { %2227 = vmatprep.mubr.msk.bf16.mxu1 %vm694_vm3, %v691_v4 }
 0x117   : > { %2228 = vmatmul.mubr.msk.bf16.gmra.mxu1 %vm694_vm3, %v692_v5 }
 0x19f   : > { %v2708_v6 = vpop.f32.mrf.mxu1 }
 0x1a0   : > { %v915_v7 = vsel %vm908_vm4, %v2708_v6, -inf }
 0x1a1   : > { %916 = vmax.xlane.f32.xlu1 %v915_v7  ;;  %v2712_v8 = vpop.f32.mrf.mxu1  ;;  %v2332_v7 = vld [vmem:[%s2840_s27 + $0x18] sm:$0xff]  }
 0x1a2   : > { %v909_v9 = vsel %vm908_vm4, %v2712_v8, -inf  ;;  %2231 = vmatprep.subr.bf16.mxu0 %v2332_v7 }
 0x1a3   : > { %910 = vmax.xlane.f32.xlu0 %v909_v9  ;;  %v2716_v55 = vpop.f32.mrf.mxu1  ;;  %v2333_v9 = vld [vmem:[%s2840_s27 + $0x10] sm:$0xff]   ;;  %2232 = vmatpush3.bf16.msra.mxu0 %v2332_v7 }
 0x1a4   : > { %v918_v10 = vsel %vm908_vm4, %v2716_v55, -inf  ;;  %2233 = vmatprep.subr.bf16.mxu0 %v2333_v9 }
 0x1a5   : > { %919 = vmax.xlane.f32.xlu1 %v918_v10  ;;  %v2720_v11 = vpop.f32.mrf.mxu1  ;;  %v2334_v10 = vld [vmem:[%s2840_s27 + $0x8] sm:$0xff]  }
 0x1a6   : > { %v912_v12 = vsel %vm908_vm4, %v2720_v11, -inf }
 0x1a7   : > { %913 = vmax.xlane.f32.xlu0 %v912_v12  ;;  %v2724_v13 = vpop.f32.mrf.mxu1  ;;  %2234 = vmatpush3.bf16.msra.mxu0 %v2333_v9 }
 0x1a8   : > { %v927_v18 = vsel %vm908_vm4, %v2724_v13, -inf  ;;  %2235 = vmatprep.subr.bf16.mxu0 %v2334_v10 }
 0x1a9   : > { %v2726_v14 = vpop.f32.mrf.mxu1 }
 0x1aa   : > { %v921_v15 = vsel %vm908_vm4, %v2726_v14, -inf }
 0x1ab   : > { %922 = vmax.xlane.f32.xlu0 %v921_v15  ;;  %v2730_v16 = vpop.f32.mrf.mxu1  ;;  %2236 = vmatpush3.bf16.msra.mxu0 %v2334_v10 }
 0x1ac   : > { %v930_v22 = vsel %vm908_vm4, %v2730_v16, -inf }
 0x1ad   : > { %v2732_v17 = vpop.f32.mrf.mxu1 }
 0x1ae   : > { %v924_v19 = vsel %vm908_vm4, %v2732_v17, -inf }
 0x1af   : > { %928 = vmax.xlane.f32.xlu0 %v927_v18  ;;  %925 = vmax.xlane.f32.xlu1 %v924_v19  ;;  %v2738_v20 = vpop.f32.mrf.mxu1 }
 0x1b0   : > { %v939_v26 = vsel %vm908_vm4, %v2738_v20, -inf }
 0x1b1   : > { %v2740_v21 = vpop.f32.mrf.mxu1 }
 0x1b2   : > { %v933_v23 = vsel %vm908_vm4, %v2740_v21, -inf }
 0x1b3   : > { %931 = vmax.xlane.f32.xlu1 %v930_v22  ;;  %934 = vmax.xlane.f32.xlu0 %v933_v23  ;;  %v2746_v24 = vpop.f32.mrf.mxu1 }
 0x1b4   : > { %v942_v30 = vsel %vm908_vm4, %v2746_v24, -inf }
 0x1b5   : > { %v2748_v25 = vpop.f32.mrf.mxu1 }
 0x1b6   : > { %v936_v27 = vsel %vm908_vm4, %v2748_v25, -inf }
 0x1b7   : > { %940 = vmax.xlane.f32.xlu0 %v939_v26  ;;  %937 = vmax.xlane.f32.xlu1 %v936_v27  ;;  %v2754_v28 = vpop.f32.mrf.mxu1 }
 0x1b8   : > { %v951_v34 = vsel %vm908_vm4, %v2754_v28, -inf }
 0x1b9   : > { %v2756_v29 = vpop.f32.mrf.mxu1 }
 0x1ba   : > { %v945_v31 = vsel %vm908_vm4, %v2756_v29, -inf }
 0x1bb   : > { %943 = vmax.xlane.f32.xlu1 %v942_v30  ;;  %946 = vmax.xlane.f32.xlu0 %v945_v31  ;;  %v2762_v32 = vpop.f32.mrf.mxu1 }
 0x1bc   : > { %v954_v38 = vsel %vm908_vm4, %v2762_v32, -inf }
 0x1bd   : > { %v2764_v33 = vpop.f32.mrf.mxu1 }
 0x1be   : > { %v948_v35 = vsel %vm908_vm4, %v2764_v33, -inf }
 0x1bf   : > { %952 = vmax.xlane.f32.xlu0 %v951_v34  ;;  %949 = vmax.xlane.f32.xlu1 %v948_v35  ;;  %v2770_v36 = vpop.f32.mrf.mxu1 }
 0x1c0   : > { %v963_v42 = vsel %vm908_vm4, %v2770_v36, -inf }
 0x1c1   : > { %v2772_v37 = vpop.f32.mrf.mxu1 }
 0x1c2   : > { %v957_v39 = vsel %vm908_vm4, %v2772_v37, -inf }
 0x1c3   : > { %955 = vmax.xlane.f32.xlu1 %v954_v38  ;;  %958 = vmax.xlane.f32.xlu0 %v957_v39  ;;  %v2778_v40 = vpop.f32.mrf.mxu1 }
 0x1c4   : > { %v966_v46 = vsel %vm908_vm4, %v2778_v40, -inf }
 0x1c5   : > { %v2780_v41 = vpop.f32.mrf.mxu1 }
 0x1c6   : > { %v960_v43 = vsel %vm908_vm4, %v2780_v41, -inf }
 0x1c7   : > { %964 = vmax.xlane.f32.xlu0 %v963_v42  ;;  %961 = vmax.xlane.f32.xlu1 %v960_v43  ;;  %v2786_v44 = vpop.f32.mrf.mxu1 }
 0x1c8   : > { %v975_v50 = vsel %vm908_vm4, %v2786_v44, -inf }
 0x1c9   : > { %v2788_v45 = vpop.f32.mrf.mxu1 }
 0x1ca   : > { %v969_v47 = vsel %vm908_vm4, %v2788_v45, -inf }
 0x1cb   : > { %967 = vmax.xlane.f32.xlu1 %v966_v46  ;;  %970 = vmax.xlane.f32.xlu0 %v969_v47  ;;  %v2794_v48 = vpop.f32.mrf.mxu1 }
 0x1cc   : > { %v978_v54 = vsel %vm908_vm4, %v2794_v48, -inf }
 0x1cd   : > { %v2796_v49 = vpop.f32.mrf.mxu1 }
 0x1ce   : > { %v972_v51 = vsel %vm908_vm4, %v2796_v49, -inf }
 0x1cf   : > { %976 = vmax.xlane.f32.xlu0 %v975_v50  ;;  %973 = vmax.xlane.f32.xlu1 %v972_v51  ;;  %v2802_v52 = vpop.f32.mrf.mxu1 }
 0x1d0   : > { %v987_v59 = vsel %vm908_vm4, %v2802_v52, -inf }
 0x1d1   : > { %v2804_v53 = vpop.f32.mrf.mxu1 }
 0x1d2   : > { %v981_v56 = vsel %vm908_vm4, %v2804_v53, -inf }
 0x1d3   : > { %979 = vmax.xlane.f32.xlu1 %v978_v54  ;;  %982 = vmax.xlane.f32.xlu0 %v981_v56  ;;  %v2810_v57 = vpop.f32.mrf.mxu1 }
 0x1d4   : > { %v990_v63 = vsel %vm908_vm4, %v2810_v57, -inf }
 0x1d5   : > { %v2812_v58 = vpop.f32.mrf.mxu1 }
 0x1d6   : > { %v984_v60 = vsel %vm908_vm4, %v2812_v58, -inf }
 0x1d7   : > { %988 = vmax.xlane.f32.xlu0 %v987_v59  ;;  %985 = vmax.xlane.f32.xlu1 %v984_v60  ;;  %v2818_v61 = vpop.f32.mrf.mxu1 }
 0x1d8   : > { %v999_v3 = vsel %vm908_vm4, %v2818_v61, -inf }
 0x1d9   : > { %v2820_v62 = vpop.f32.mrf.mxu1 }
 0x1da   : > { %v993_v0 = vsel %vm908_vm4, %v2820_v62, -inf }
 0x1db   : > { %991 = vmax.xlane.f32.xlu1 %v990_v63  ;;  %994 = vmax.xlane.f32.xlu0 %v993_v0  ;;  %v2826_v1 = vpop.f32.mrf.mxu1 }
 0x1dc   : > { %v1002_v5 = vsel %vm908_vm4, %v2826_v1, -inf }
 0x1dd   : > { %v2828_v2 = vpop.f32.mrf.mxu1 }
 0x1de   : > { %v996_v4 = vsel %vm908_vm4, %v2828_v2, -inf }
 0x1df   : > { %1000 = vmax.xlane.f32.xlu0 %v999_v3  ;;  %997 = vmax.xlane.f32.xlu1 %v996_v4 }
 0x1e3   : > { %1003 = vmax.xlane.f32.xlu1 %v1002_v5 }
 0x22a   : > { %v917_v12 = vpop.xlane.xlu1 %916 }
 0x22b   : > { %v1007_v15 = vsub.f32 %v2708_v6, %v917_v12 }
 0x22c   : > { %v911_v18 = vpop.xlane.xlu0 %910 }
 0x22d   : > { %v1005_v19 = vsub.f32 %v2712_v8, %v911_v18  ;;  %v1041_v23 = vmul.f32 1.442695, %v1007_v15 }
 0x22e   : > { %v920_v22 = vpop.xlane.xlu1 %919 }
 0x22f   : > { %v1037_v26 = vmul.f32 1.442695, %v1005_v19  ;;  %v1008_v27 = vsub.f32 %v2716_v55, %v920_v22 }
 0x230   : > { %v914_v30 = vpop.xlane.xlu0 %913 }
 0x231   : > { %2336 = vpow2.f32 %v1037_v26  ;;  %v1006_v31 = vsub.f32 %v2720_v11, %v914_v30  ;;  %v1043_v34 = vmul.f32 1.442695, %v1008_v27 }
 0x232   : > { %2338 = vpow2.f32 %v1041_v23 }
 0x233   : > { %v1039_v35 = vmul.f32 1.442695, %v1006_v31 }
 0x234   : > { %v923_v38 = vpop.xlane.xlu0 %922 }
 0x235   : > { %2340 = vpow2.f32 %v1039_v35  ;;  %v1009_v39 = vsub.f32 %v2726_v14, %v923_v38 }
 0x236   : > { %2342 = vpow2.f32 %v1043_v34 }
 0x237   : > { %v1045_v6 = vmul.f32 1.442695, %v1009_v39 }
 0x238   : > { %v929_v42 = vpop.xlane.xlu0 %928  ;;  %v926_v8 = vpop.xlane.xlu1 %925 }
 0x239   : > { %2344 = vpow2.f32 %v1045_v6  ;;  %v1011_v43 = vsub.f32 %v2724_v13, %v929_v42  ;;  %v1010_v55 = vsub.f32 %v2732_v17, %v926_v8 }
 0x23b   : > { %v1049_v46 = vmul.f32 1.442695, %v1011_v43  ;;  %v1047_v47 = vmul.f32 1.442695, %v1010_v55 }
 0x23c   : > { %v932_v50 = vpop.xlane.xlu1 %931  ;;  %v935_v11 = vpop.xlane.xlu0 %934 }
 0x23d   : > { %2346 = vpow2.f32 %v1049_v46  ;;  %v1012_v51 = vsub.f32 %v2730_v16, %v932_v50  ;;  %v1013_v54 = vsub.f32 %v2740_v21, %v935_v11 }
 0x23e   : > { %v2854_v56 = vpop.eup %2336  ;;  %2348 = vpow2.f32 %v1047_v47 }
 0x23f   : > { %v1051_v14 = vmul.f32 1.442695, %v1012_v51  ;;  %v1053_v59 = vmul.f32 1.442695, %v1013_v54  ;;  %v1101_v60 = vsel %vm908_vm4, %v2854_v56, 0.0  ;;  %v2858_v13 = vpop.eup %2338 }
 0x240   : > { %v941_v17 = vpop.xlane.xlu0 %940  ;;  %v938_v63 = vpop.xlane.xlu1 %937  ;;  %1102 = vadd.xlane.f32.xlu0 %v1101_v60  ;;  %v1107_v5 = vsel %vm908_vm4, %v2858_v13, 0.0 }
 0x241   : > { %2350 = vpow2.f32 %v1051_v14  ;;  %v1015_v0 = vsub.f32 %v2738_v20, %v941_v17  ;;  %v1014_v16 = vsub.f32 %v2748_v25, %v938_v63 }
 0x242   : > { %v2862_v3 = vpop.eup %2340  ;;  %2352 = vpow2.f32 %v1053_v59 }
 0x243   : > { %v1057_v21 = vmul.f32 1.442695, %v1015_v0  ;;  %v1055_v4 = vmul.f32 1.442695, %v1014_v16  ;;  %v1104_v7 = vsel %vm908_vm4, %v2862_v3, 0.0  ;;  %v2868_v9 = vpop.eup %2342 }
 0x244   : > { %v944_v10 = vpop.xlane.xlu1 %943  ;;  %v947_v12 = vpop.xlane.xlu0 %946  ;;  %1108 = vadd.xlane.f32.xlu0 %v1107_v5  ;;  %1105 = vadd.xlane.f32.xlu1 %v1104_v7  ;;  %v1110_v23 = vsel %vm908_vm4, %v2868_v9, 0.0 }
 0x245   : > { %2354 = vpow2.f32 %v1057_v21  ;;  %v1016_v20 = vsub.f32 %v2746_v24, %v944_v10  ;;  %v1017_v25 = vsub.f32 %v2756_v29, %v947_v12 }
 0x246   : > { %v2872_v15 = vpop.eup %2344  ;;  %2356 = vpow2.f32 %v1055_v4 }
 0x247   : > { %v1059_v18 = vmul.f32 1.442695, %v1016_v20  ;;  %v1061_v19 = vmul.f32 1.442695, %v1017_v25  ;;  %v1113_v22 = vsel %vm908_vm4, %v2872_v15, 0.0 }
 0x248   : > { %v953_v26 = vpop.xlane.xlu0 %952  ;;  %v950_v27 = vpop.xlane.xlu1 %949  ;;  %1114 = vadd.xlane.f32.xlu0 %v1113_v22  ;;  %1111 = vadd.xlane.f32.xlu1 %v1110_v23 }
 0x249   : > { %2358 = vpow2.f32 %v1059_v18  ;;  %v1019_v24 = vsub.f32 %v2754_v28, %v953_v26  ;;  %v1018_v29 = vsub.f32 %v2764_v33, %v950_v27 }
 0x24a   : > { %v2880_v30 = vpop.eup %2346  ;;  %2360 = vpow2.f32 %v1061_v19 }
 0x24b   : > { %v2882_v31 = vpop.eup %2348  ;;  %v1065_v34 = vmul.f32 1.442695, %v1019_v24  ;;  %v1063_v35 = vmul.f32 1.442695, %v1018_v29  ;;  %v1119_v38 = vsel %vm908_vm4, %v2880_v30, 0.0 }
 0x24c   : > { %v956_v39 = vpop.xlane.xlu1 %955  ;;  %v959_v6 = vpop.xlane.xlu0 %958  ;;  %1120 = vadd.xlane.f32.xlu0 %v1119_v38  ;;  %v1116_v42 = vsel %vm908_vm4, %v2882_v31, 0.0 }
 0x24d   : > { %2362 = vpow2.f32 %v1065_v34  ;;  %v1020_v28 = vsub.f32 %v2762_v32, %v956_v39  ;;  %v1021_v33 = vsub.f32 %v2772_v37, %v959_v6  ;;  %1117 = vadd.xlane.f32.xlu1 %v1116_v42  ;;  %v2335_v42 = vld [vmem:[%s2840_s27] sm:$0xff]  }
 0x24e   : > { %v2890_v8 = vpop.eup %2350  ;;  %2364 = vpow2.f32 %v1063_v35  ;;  %2237 = vmatprep.subr.bf16.mxu0 %v2335_v42 }
 0x24f   : > { %v2892_v43 = vpop.eup %2352  ;;  %v1067_v55 = vmul.f32 1.442695, %v1020_v28  ;;  %v1069_v46 = vmul.f32 1.442695, %v1021_v33  ;;  %v1122_v47 = vsel %vm908_vm4, %v2890_v8, 0.0  ;;  %2238 = vmatpush3.bf16.msra.mxu0 %v2335_v42 }
 0x250   : > { %v965_v50 = vpop.xlane.xlu0 %964  ;;  %v962_v11 = vpop.xlane.xlu1 %961  ;;  %v1125_v51 = vsel %vm908_vm4, %v2892_v43, 0.0 }
 0x251   : > { %2366 = vpow2.f32 %v1067_v55  ;;  %v1023_v32 = vsub.f32 %v2770_v36, %v965_v50  ;;  %v1022_v37 = vsub.f32 %v2780_v41, %v962_v11  ;;  %1126 = vadd.xlane.f32.xlu0 %v1125_v51  ;;  %1123 = vadd.xlane.f32.xlu1 %v1122_v47 }
 0x252   : > { %v2900_v54 = vpop.eup %2354  ;;  %2368 = vpow2.f32 %v1069_v46 }
 0x253   : > { %v2902_v14 = vpop.eup %2356  ;;  %v1073_v59 = vmul.f32 1.442695, %v1023_v32  ;;  %v1071_v60 = vmul.f32 1.442695, %v1022_v37  ;;  %v1131_v17 = vsel %vm908_vm4, %v2900_v54, 0.0 }
 0x254   : > { %v968_v63 = vpop.xlane.xlu1 %967  ;;  %v971_v0 = vpop.xlane.xlu0 %970  ;;  %v1128_v16 = vsel %vm908_vm4, %v2902_v14, 0.0 }
 0x255   : > { %2370 = vpow2.f32 %v1073_v59  ;;  %v1024_v36 = vsub.f32 %v2778_v40, %v968_v63  ;;  %v1025_v41 = vsub.f32 %v2788_v45, %v971_v0  ;;  %1132 = vadd.xlane.f32.xlu0 %v1131_v17  ;;  %1129 = vadd.xlane.f32.xlu1 %v1128_v16 }
 0x256   : > { %v2910_v21 = vpop.eup %2358  ;;  %2372 = vpow2.f32 %v1071_v60 }
 0x257   : > { %v2912_v4 = vpop.eup %2360  ;;  %v1075_v5 = vmul.f32 1.442695, %v1024_v36  ;;  %v1077_v7 = vmul.f32 1.442695, %v1025_v41  ;;  %v1134_v10 = vsel %vm908_vm4, %v2910_v21, 0.0 }
 0x258   : > { %v977_v12 = vpop.xlane.xlu0 %976  ;;  %v974_v20 = vpop.xlane.xlu1 %973  ;;  %v1137_v25 = vsel %vm908_vm4, %v2912_v4, 0.0 }
 0x259   : > { %2374 = vpow2.f32 %v1075_v5  ;;  %v1027_v40 = vsub.f32 %v2786_v44, %v977_v12  ;;  %v1026_v45 = vsub.f32 %v2796_v49, %v974_v20  ;;  %1138 = vadd.xlane.f32.xlu0 %v1137_v25  ;;  %1135 = vadd.xlane.f32.xlu1 %v1134_v10 }
 0x25a   : > { %v2920_v18 = vpop.eup %2362  ;;  %2376 = vpow2.f32 %v1077_v7 }
 0x25b   : > { %v2922_v19 = vpop.eup %2364  ;;  %v1081_v22 = vmul.f32 1.442695, %v1027_v40  ;;  %v1079_v23 = vmul.f32 1.442695, %v1026_v45  ;;  %v1143_v26 = vsel %vm908_vm4, %v2920_v18, 0.0 }
 0x25c   : > { %v980_v27 = vpop.xlane.xlu1 %979  ;;  %v983_v24 = vpop.xlane.xlu0 %982  ;;  %v1140_v44 = vsel %vm908_vm4, %v2922_v19, 0.0 }
 0x25d   : > { %2378 = vpow2.f32 %v1081_v22  ;;  %v1028_v49 = vsub.f32 %v2794_v48, %v980_v27  ;;  %v1029_v29 = vsub.f32 %v2804_v53, %v983_v24  ;;  %1144 = vadd.xlane.f32.xlu0 %v1143_v26  ;;  %1141 = vadd.xlane.f32.xlu1 %v1140_v44 }
 0x25e   : > { %v2930_v34 = vpop.eup %2366  ;;  %2380 = vpow2.f32 %v1079_v23 }
 0x25f   : > { %v2932_v35 = vpop.eup %2368  ;;  %v1083_v38 = vmul.f32 1.442695, %v1028_v49  ;;  %v1085_v39 = vmul.f32 1.442695, %v1029_v29  ;;  %v1146_v6 = vsel %vm908_vm4, %v2930_v34, 0.0 }
 0x260   : > { %v989_v28 = vpop.xlane.xlu0 %988  ;;  %v986_v33 = vpop.xlane.xlu1 %985  ;;  %v1149_v48 = vsel %vm908_vm4, %v2932_v35, 0.0 }
 0x261   : > { %2382 = vpow2.f32 %v1083_v38  ;;  %v1031_v53 = vsub.f32 %v2802_v52, %v989_v28  ;;  %v1030_v55 = vsub.f32 %v2812_v58, %v986_v33  ;;  %1150 = vadd.xlane.f32.xlu0 %v1149_v48  ;;  %1147 = vadd.xlane.f32.xlu1 %v1146_v6 }
 0x262   : > { %v2941_v46 = vpop.eup %2370  ;;  %2384 = vpow2.f32 %v1085_v39 }
 0x263   : > { %v2943_v47 = vpop.eup %2372  ;;  %v1089_v50 = vmul.f32 1.442695, %v1031_v53  ;;  %v1087_v11 = vmul.f32 1.442695, %v1030_v55  ;;  %v1155_v51 = vsel %vm908_vm4, %v2941_v46, 0.0 }
 0x264   : > { %v992_v32 = vpop.xlane.xlu1 %991  ;;  %v995_v37 = vpop.xlane.xlu0 %994  ;;  %v1152_v52 = vsel %vm908_vm4, %v2943_v47, 0.0 }
 0x265   : > { %2386 = vpow2.f32 %v1089_v50  ;;  %v1032_v58 = vsub.f32 %v2810_v57, %v992_v32  ;;  %1156 = vadd.xlane.f32.xlu0 %v1155_v51  ;;  %v1033_v59 = vsub.f32 %v2820_v62, %v995_v37  ;;  %1153 = vadd.xlane.f32.xlu1 %v1152_v52  ;;  %v1534_v50 = vld [vmem:[%s3303_s5] sm:$0x1] }
 0x266   : > { %v2951_v60 = vpop.eup %2374  ;;  %2388 = vpow2.f32 %v1087_v11  ;;  %2307 = vmatprep.subr.msk.bf16.mxu1 %vm743_vm2, %v1534_v50  ;;  %v1591_v11 = vsel %vm743_vm2, %v1534_v50, 0 }
 0x267   : > { %v2953_v17 = vpop.eup %2376  ;;  %v1091_v63 = vmul.f32 1.442695, %v1032_v58  ;;  %v1093_v0 = vmul.f32 1.442695, %v1033_v59  ;;  %v1158_v16 = vsel %vm908_vm4, %v2951_v60, 0.0  ;;  %2272 = vmatpush3.bf16.msra.mxu1 %v1591_v11 }
 0x268   : > { %v1161_v36 = vsel %vm908_vm4, %v2953_v17, 0.0  ;;  %v1001_v41 = vpop.xlane.xlu0 %1000  ;;  %v998_v5 = vpop.xlane.xlu1 %997 }
 0x269   : > { %2390 = vpow2.f32 %v1091_v63  ;;  %1162 = vadd.xlane.f32.xlu0 %v1161_v36  ;;  %v1035_v57 = vsub.f32 %v2818_v61, %v1001_v41  ;;  %1159 = vadd.xlane.f32.xlu1 %v1158_v16  ;;  %v1034_v62 = vsub.f32 %v2828_v2, %v998_v5 }
 0x26a   : > { %v2961_v7 = vpop.eup %2378  ;;  %2392 = vpow2.f32 %v1093_v0 }
 0x26b   : > { %v2963_v10 = vpop.eup %2380  ;;  %v1097_v12 = vmul.f32 1.442695, %v1035_v57  ;;  %v1095_v20 = vmul.f32 1.442695, %v1034_v62  ;;  %v1167_v25 = vsel %vm908_vm4, %v2961_v7, 0.0 }
 0x26c   : > { %v1164_v40 = vsel %vm908_vm4, %v2963_v10, 0.0  ;;  %v1004_v45 = vpop.xlane.xlu1 %1003 }
 0x26d   : > { %2394 = vpow2.f32 %v1097_v12  ;;  %1168 = vadd.xlane.f32.xlu0 %v1167_v25  ;;  %1165 = vadd.xlane.f32.xlu1 %v1164_v40  ;;  %v1036_v61 = vsub.f32 %v2826_v1, %v1004_v45 }
 0x26e   : > { %v2970_v2 = vpop.eup %2382  ;;  %2396 = vpow2.f32 %v1095_v20 }
 0x26f   : > { %v2972_v22 = vpop.eup %2384  ;;  %v1099_v23 = vmul.f32 1.442695, %v1036_v61  ;;  %v1170_v26 = vsel %vm908_vm4, %v2970_v2, 0.0 }
 0x270   : > { %v1173_v27 = vsel %vm908_vm4, %v2972_v22, 0.0 }
 0x271   : > { %2398 = vpow2.f32 %v1099_v23  ;;  %1174 = vadd.xlane.f32.xlu0 %v1173_v27  ;;  %1171 = vadd.xlane.f32.xlu1 %v1170_v26 }
 0x272   : > { %v2978_v24 = vpop.eup %2386 }
 0x273   : > { %v2980_v44 = vpop.eup %2388  ;;  %v1179_v1 = vsel %vm908_vm4, %v2978_v24, 0.0 }
 0x274   : > { %v1176_v49 = vsel %vm908_vm4, %v2980_v44, 0.0 }
 0x275   : > { %1180 = vadd.xlane.f32.xlu0 %v1179_v1  ;;  %1177 = vadd.xlane.f32.xlu1 %v1176_v49 }
 0x276   : > { %v2986_v29 = vpop.eup %2390 }
 0x277   : > { %v2988_v38 = vpop.eup %2392  ;;  %v1182_v39 = vsel %vm908_vm4, %v2986_v29, 0.0 }
 0x278   : > { %v1185_v6 = vsel %vm908_vm4, %v2988_v38, 0.0 }
 0x279   : > { %1186 = vadd.xlane.f32.xlu0 %v1185_v6  ;;  %1183 = vadd.xlane.f32.xlu1 %v1182_v39 }
 0x27a   : > { %v2994_v42 = vpop.eup %2394 }
 0x27b   : > { %v2996_v28 = vpop.eup %2396  ;;  %v1191_v33 = vsel %vm908_vm4, %v2994_v42, 0.0 }
 0x27c   : > { %v1188_v48 = vsel %vm908_vm4, %v2996_v28, 0.0 }
 0x27d   : > { %1192 = vadd.xlane.f32.xlu0 %v1191_v33  ;;  %1189 = vadd.xlane.f32.xlu1 %v1188_v48 }
 0x27e   : > { %v3002_v53 = vpop.eup %2398 }
 0x27f   : > { %v1194_v55 = vsel %vm908_vm4, %v3002_v53, 0.0 }
 0x281   : > { %1195 = vadd.xlane.f32.xlu1 %v1194_v55 }
 0x2c9   : > { %v1103_v51 = vpop.xlane.xlu0 %1102 }
 0x2ca   : > { %2400 = vrcp.f32 %v1103_v51 }
 0x2cd   : > { %v1109_v32 = vpop.xlane.xlu0 %1108  ;;  %v1106_v37 = vpop.xlane.xlu1 %1105 }
 0x2ce   : > { %2402 = vrcp.f32 %v1106_v37 }
 0x2cf   : > { %2404 = vrcp.f32 %v1109_v32 }
 0x2d1   : > { %v1115_v52 = vpop.xlane.xlu0 %1114  ;;  %v1112_v58 = vpop.xlane.xlu1 %1111 }
 0x2d2   : > { %2406 = vrcp.f32 %v1112_v58 }
 0x2d3   : > { %2408 = vrcp.f32 %v1115_v52 }
 0x2d5   : > { %v1121_v59 = vpop.xlane.xlu0 %1120 }
 0x2d6   : > { %v1118_v63 = vpop.xlane.xlu1 %1117 }
 0x2d7   : > { %2410 = vrcp.f32 %v1118_v63  ;;  %v2401_v0 = vpop.eup %2400 }
 0x2d8   : > { %2412 = vrcp.f32 %v1121_v59  ;;  %v1229_v5 = vmul.f32 %v2401_v0, %v2854_v56 }
 0x2da   : > { %v1127_v16 = vpop.xlane.xlu0 %1126  ;;  %v1124_v36 = vpop.xlane.xlu1 %1123 }
 0x2db   : > { %v2403_v41 = vpop.eup %2402  ;;  %2414 = vrcp.f32 %v1124_v36 }
 0x2dc   : > { %v1230_v57 = vmul.f32 %v2403_v41, %v2862_v3  ;;  %v2405_v62 = vpop.eup %2404  ;;  %2416 = vrcp.f32 %v1127_v16 }
 0x2dd   : > { %v1231_v45 = vmul.f32 %v2405_v62, %v2858_v13 }
 0x2de   : > { %v1133_v12 = vpop.xlane.xlu0 %1132  ;;  %v1130_v20 = vpop.xlane.xlu1 %1129  ;;  %v1261_v25 = vpack.c.bf16 %v1230_v57, %v1229_v5 }
 0x2df   : > { %v2407_v40 = vpop.eup %2406  ;;  %2418 = vrcp.f32 %v1130_v20 }
 0x2e0   : > { %v1232_v61 = vmul.f32 %v2407_v40, %v2868_v9  ;;  %2239 = vmatprep.mubr.msk.bf16.mxu0 %vm908_vm4, %v1261_v25  ;;  %v2409_v23 = vpop.eup %2408  ;;  %2420 = vrcp.f32 %v1133_v12 }
 0x2e1   : > { %v1233_v3 = vmul.f32 %v2409_v23, %v2872_v15 }
 0x2e2   : > { %v1139_v26 = vpop.xlane.xlu0 %1138  ;;  %v1136_v27 = vpop.xlane.xlu1 %1135  ;;  %v1262_v56 = vpack.c.bf16 %v1232_v61, %v1231_v45 }
 0x2e3   : > { %2422 = vrcp.f32 %v1136_v27 }
 0x2e4   : > { %v2411_v1 = vpop.eup %2410  ;;  %2240 = vmatmul.mubr.msk.bf16.vlgmr.msra.gmra.mxu0 %vm908_vm4, %v1262_v56  ;;  %2424 = vrcp.f32 %v1139_v26 }
 0x2e5   : > { %v1234_v49 = vmul.f32 %v2411_v1, %v2882_v31  ;;  %v2413_v6 = vpop.eup %2412 }
 0x2e6   : > { %v1145_v39 = vpop.xlane.xlu0 %1144  ;;  %v1142_v13 = vpop.xlane.xlu1 %1141  ;;  %v1235_v50 = vmul.f32 %v2413_v6, %v2880_v30 }
 0x2e7   : > { %v1263_v9 = vpack.c.bf16 %v1234_v49, %v1233_v3  ;;  %2426 = vrcp.f32 %v1142_v13 }
 0x2e8   : > { %v2415_v33 = vpop.eup %2414  ;;  %2428 = vrcp.f32 %v1145_v39 }
 0x2e9   : > { %2243 = vmatprep.mubr.msk.bf16.mxu0 %vm908_vm4, %v1263_v9  ;;  %v1236_v11 = vmul.f32 %v2415_v33, %v2890_v8  ;;  %v2417_v51 = vpop.eup %2416 }
 0x2ea   : > { %v1151_v48 = vpop.xlane.xlu0 %1150  ;;  %v1148_v55 = vpop.xlane.xlu1 %1147  ;;  %v1237_v52 = vmul.f32 %v2417_v51, %v2892_v43 }
 0x2eb   : > { %2430 = vrcp.f32 %v1148_v55  ;;  %v1264_v15 = vpack.c.bf16 %v1236_v11, %v1235_v50 }
 0x2ec   : > { %v2419_v31 = vpop.eup %2418  ;;  %2432 = vrcp.f32 %v1151_v48 }
 0x2ed   : > { %2244 = vmatmul.mubr.msk.bf16.gmra.mxu0 %vm908_vm4, %v1264_v15  ;;  %v1238_v58 = vmul.f32 %v2419_v31, %v2902_v14  ;;  %v2421_v59 = vpop.eup %2420 }
 0x2ee   : > { %v1157_v32 = vpop.xlane.xlu0 %1156  ;;  %v1154_v37 = vpop.xlane.xlu1 %1153  ;;  %v1239_v16 = vmul.f32 %v2421_v59, %v2900_v54 }
 0x2ef   : > { %2434 = vrcp.f32 %v1154_v37  ;;  %v1265_v63 = vpack.c.bf16 %v1238_v58, %v1237_v52 }
 0x2f0   : > { %v2423_v0 = vpop.eup %2422  ;;  %2436 = vrcp.f32 %v1157_v32 }
 0x2f1   : > { %2247 = vmatprep.mubr.msk.bf16.mxu0 %vm908_vm4, %v1265_v63  ;;  %v1240_v36 = vmul.f32 %v2423_v0, %v2910_v21  ;;  %v2425_v41 = vpop.eup %2424 }
 0x2f2   : > { %v1163_v30 = vpop.xlane.xlu0 %1162  ;;  %v1160_v8 = vpop.xlane.xlu1 %1159  ;;  %v1241_v62 = vmul.f32 %v2425_v41, %v2912_v4 }
 0x2f3   : > { %2438 = vrcp.f32 %v1160_v8  ;;  %v1266_v5 = vpack.c.bf16 %v1240_v36, %v1239_v16 }
 0x2f4   : > { %v2427_v57 = vpop.eup %2426  ;;  %2440 = vrcp.f32 %v1163_v30 }
 0x2f5   : > { %2248 = vmatmul.mubr.msk.bf16.gmra.mxu0 %vm908_vm4, %v1266_v5  ;;  %v1242_v12 = vmul.f32 %v2427_v57, %v2922_v19  ;;  %v2429_v20 = vpop.eup %2428 }
 0x2f6   : > { %v1169_v43 = vpop.xlane.xlu0 %1168  ;;  %v1166_v14 = vpop.xlane.xlu1 %1165  ;;  %v1243_v45 = vmul.f32 %v2429_v20, %v2920_v18 }
 0x2f7   : > { %2442 = vrcp.f32 %v1166_v14  ;;  %v1267_v25 = vpack.c.bf16 %v1242_v12, %v1241_v62 }
 0x2f8   : > { %v2431_v40 = vpop.eup %2430  ;;  %2444 = vrcp.f32 %v1169_v43 }
 0x2f9   : > { %2251 = vmatprep.mubr.msk.bf16.mxu0 %vm908_vm4, %v1267_v25  ;;  %v1244_v61 = vmul.f32 %v2431_v40, %v2930_v34  ;;  %v2433_v23 = vpop.eup %2432 }
 0x2fa   : > { %v1175_v54 = vpop.xlane.xlu0 %1174  ;;  %v1172_v21 = vpop.xlane.xlu1 %1171  ;;  %v1245_v56 = vmul.f32 %v2433_v23, %v2932_v35 }
 0x2fb   : > { %2446 = vrcp.f32 %v1172_v21  ;;  %v1268_v26 = vpack.c.bf16 %v1244_v61, %v1243_v45 }
 0x2fc   : > { %v2435_v27 = vpop.eup %2434  ;;  %2448 = vrcp.f32 %v1175_v54 }
 0x2fd   : > { %2252 = vmatmul.mubr.msk.bf16.gmra.mxu0 %vm908_vm4, %v1268_v26  ;;  %v1246_v1 = vmul.f32 %v2435_v27, %v2943_v47  ;;  %v2437_v3 = vpop.eup %2436 }
 0x2fe   : > { %v1181_v4 = vpop.xlane.xlu0 %1180  ;;  %v1178_v19 = vpop.xlane.xlu1 %1177  ;;  %v1247_v13 = vmul.f32 %v2437_v3, %v2941_v46 }
 0x2ff   : > { %2450 = vrcp.f32 %v1178_v19  ;;  %v1269_v49 = vpack.c.bf16 %v1246_v1, %v1245_v56 }
 0x300   : > { %v2439_v39 = vpop.eup %2438  ;;  %2452 = vrcp.f32 %v1181_v4 }
 0x301   : > { %2255 = vmatprep.mubr.msk.bf16.mxu0 %vm908_vm4, %v1269_v49  ;;  %v1248_v6 = vmul.f32 %v2439_v39, %v2951_v60  ;;  %v2441_v9 = vpop.eup %2440 }
 0x302   : > { %v1187_v18 = vpop.xlane.xlu0 %1186  ;;  %v1184_v34 = vpop.xlane.xlu1 %1183  ;;  %v1249_v55 = vmul.f32 %v2441_v9, %v2953_v17 }
 0x303   : > { %2454 = vrcp.f32 %v1184_v34  ;;  %v1270_v33 = vpack.c.bf16 %v1248_v6, %v1247_v13 }
 0x304   : > { %v2443_v48 = vpop.eup %2442  ;;  %2456 = vrcp.f32 %v1187_v18 }
 0x305   : > { %2256 = vmatmul.mubr.msk.bf16.gmra.mxu0 %vm908_vm4, %v1270_v33  ;;  %v1250_v50 = vmul.f32 %v2443_v48, %v2963_v10  ;;  %v2445_v11 = vpop.eup %2444 }
 0x306   : > { %v1193_v35 = vpop.xlane.xlu0 %1192  ;;  %v1190_v47 = vpop.xlane.xlu1 %1189  ;;  %v1251_v60 = vmul.f32 %v2445_v11, %v2961_v7 }
 0x307   : > { %2458 = vrcp.f32 %v1190_v47  ;;  %v1271_v51 = vpack.c.bf16 %v1250_v50, %v1249_v55 }
 0x308   : > { %v2447_v15 = vpop.eup %2446  ;;  %2460 = vrcp.f32 %v1193_v35 }
 0x309   : > { %2259 = vmatprep.mubr.msk.bf16.mxu0 %vm908_vm4, %v1271_v51  ;;  %v1252_v31 = vmul.f32 %v2447_v15, %v2970_v2  ;;  %v2449_v32 = vpop.eup %2448 }
 0x30a   : > { %v1196_v46 = vpop.xlane.xlu1 %1195  ;;  %v1253_v17 = vmul.f32 %v2449_v32, %v2972_v22 }
 0x30b   : > { %2462 = vrcp.f32 %v1196_v46  ;;  %v1272_v37 = vpack.c.bf16 %v1252_v31, %v1251_v60 }
 0x30c   : > { %v2451_v52 = vpop.eup %2450 }
 0x30d   : > { %2260 = vmatmul.mubr.msk.bf16.gmra.mxu0 %vm908_vm4, %v1272_v37  ;;  %v1254_v10 = vmul.f32 %v2451_v52, %v2980_v44  ;;  %v2453_v58 = vpop.eup %2452 }
 0x30e   : > { %v1255_v0 = vmul.f32 %v2453_v58, %v2978_v24  ;;  %v3078_v58 = vld [vmem:[%s3304_s6] ss:$0 sm:$0xff] }
 0x30f   : > { %v1273_v59 = vpack.c.bf16 %v1254_v10, %v1253_v17 }
 0x310   : > { %v2455_v63 = vpop.eup %2454 }
 0x311   : > { %2263 = vmatprep.mubr.msk.bf16.mxu0 %vm908_vm4, %v1273_v59  ;;  %v1256_v7 = vmul.f32 %v2455_v63, %v2986_v29  ;;  %v2457_v2 = vpop.eup %2456  ;;  %v3083_v63 = vld [vmem:[%s3305_s7] ss:$0 sm:$0xff] }
 0x312   : > { %v1257_v36 = vmul.f32 %v2457_v2, %v2988_v38 }
 0x313   : > { %v1274_v30 = vpack.c.bf16 %v1256_v7, %v1255_v0  ;;  %v3089_v7 = vld [vmem:[%s3306_s8] ss:$0 sm:$0xff] }
 0x314   : > { %v2459_v8 = vpop.eup %2458 }
 0x315   : > { %v2461_v16 = vpop.eup %2460  ;;  %2264 = vmatmul.mubr.msk.bf16.gmra.mxu0 %vm908_vm4, %v1274_v30  ;;  %v1258_v22 = vmul.f32 %v2459_v8, %v2996_v28 }
 0x316   : > { %v1259_v5 = vmul.f32 %v2461_v16, %v2994_v42 }
 0x317   : > { %v1275_v41 = vpack.c.bf16 %v1258_v22, %v1257_v36 }
 0x318   : > { %v2463_v44 = vpop.eup %2462 }
 0x319   : > { %v1260_v57 = vmul.f32 %v2463_v44, %v3002_v53  ;;  %2267 = vmatprep.mubr.msk.bf16.mxu0 %vm908_vm4, %v1275_v41 }
 0x31b   : > { %v1276_v24 = vpack.c.bf16 %v1260_v57, %v1259_v5  ;;  %v2464_v5 = vld [vmem:[%s2599_s18 + $0x10] sm:$0xff] }
 0x31d   : > { %2268 = vmatmul.mubr.msk.bf16.gmra.mxu0 %vm908_vm4, %v1276_v24 }
 0x3a4   : > { %v2241_v29 = vpop.f32.mrf.mxu0 }
 0x3a6   : > { %v1391_v43 = vpop.f32.mrf.mxu0 }
 0x3a8   : > { %v2242_v14 = vpop.f32.mrf.mxu0 }
 0x3a9   : > { %v1519_v20 = vpack.c.bf16 %v2242_v14, %v2241_v29  ;;  %v2465_v14 = vld [vmem:[%s2599_s18] sm:$0xff] }
 0x3aa   : > { %v1394_v62 = vpop.f32.mrf.mxu0 }
 0x3ab   : > { %v1518_v12 = vpack.c.bf16 %v1394_v62, %v1391_v43 }
 0x3ad   : > { %v2245_v38 = vpop.f32.mrf.mxu0  ;;  %2273 = vmatprep.mubr.msk.bf16.mxu1 %vm694_vm3, %v1518_v12 }
 0x3ae   : > { %2274 = vmatmul.mubr.msk.bf16.vlgmr.msra.gmra.mxu1 %vm694_vm3, %v1519_v20 }
 0x3af   : > { %v1407_v28 = vpop.f32.mrf.mxu0 }
 0x3b1   : > { %v2246_v42 = vpop.f32.mrf.mxu0 }
 0x3b2   : > { %v1521_v40 = vpack.c.bf16 %v2246_v42, %v2245_v38  ;;  %v2466_v42 = vld [vmem:[%s2599_s18 + $0x18] sm:$0xff] }
 0x3b3   : > { %v1410_v25 = vpop.f32.mrf.mxu0 }
 0x3b4   : > { %v1520_v53 = vpack.c.bf16 %v1410_v25, %v1407_v28 }
 0x3b5   : > { %v2249_v54 = vpop.f32.mrf.mxu0 }
 0x3b6   : > { %2277 = vmatprep.mubr.msk.bf16.mxu1 %vm694_vm3, %v1520_v53 }
 0x3b7   : > { %v1423_v21 = vpop.f32.mrf.mxu0  ;;  %2278 = vmatmul.mubr.msk.bf16.gmra.mxu1 %vm694_vm3, %v1521_v40 }
 0x3b9   : > { %v2250_v45 = vpop.f32.mrf.mxu0 }
 0x3ba   : > { %v1523_v26 = vpack.c.bf16 %v2250_v45, %v2249_v54  ;;  %v2467_v45 = vld [vmem:[%s2599_s18 + $0x8] sm:$0xff] }
 0x3bb   : > { %v1426_v61 = vpop.f32.mrf.mxu0 }
 0x3bc   : > { %v1522_v23 = vpack.c.bf16 %v1426_v61, %v1423_v21 }
 0x3bd   : > { %v2253_v27 = vpop.f32.mrf.mxu0 }
 0x3be   : > { %2281 = vmatprep.mubr.msk.bf16.mxu1 %vm694_vm3, %v1522_v23 }
 0x3bf   : > { %v1439_v4 = vpop.f32.mrf.mxu0  ;;  %2282 = vmatmul.mubr.msk.bf16.gmra.mxu1 %vm694_vm3, %v1523_v26 }
 0x3c1   : > { %v2254_v19 = vpop.f32.mrf.mxu0 }
 0x3c2   : > { %v1525_v3 = vpack.c.bf16 %v2254_v19, %v2253_v27 }
 0x3c3   : > { %v1442_v56 = vpop.f32.mrf.mxu0 }
 0x3c4   : > { %v1524_v1 = vpack.c.bf16 %v1442_v56, %v1439_v4  ;;  %v2468_v56 = vld [vmem:[%s2599_s18 + $0x30] sm:$0xff] }
 0x3c5   : > { %v2257_v49 = vpop.f32.mrf.mxu0 }
 0x3c6   : > { %2285 = vmatprep.mubr.msk.bf16.mxu1 %vm694_vm3, %v1524_v1 }
 0x3c7   : > { %v1455_v39 = vpop.f32.mrf.mxu0  ;;  %2286 = vmatmul.mubr.msk.bf16.gmra.mxu1 %vm694_vm3, %v1525_v3 }
 0x3c9   : > { %v2258_v18 = vpop.f32.mrf.mxu0 }
 0x3ca   : > { %v1527_v6 = vpack.c.bf16 %v2258_v18, %v2257_v49 }
 0x3cb   : > { %v1458_v34 = vpop.f32.mrf.mxu0 }
 0x3cc   : > { %v1526_v13 = vpack.c.bf16 %v1458_v34, %v1455_v39  ;;  %v2469_v34 = vld [vmem:[%s2599_s18 + $0x20] sm:$0xff] }
 0x3cd   : > { %v2261_v9 = vpop.f32.mrf.mxu0 }
 0x3ce   : > { %2289 = vmatprep.mubr.msk.bf16.mxu1 %vm694_vm3, %v1526_v13 }
 0x3cf   : > { %v1471_v33 = vpop.f32.mrf.mxu0  ;;  %2290 = vmatmul.mubr.msk.bf16.gmra.mxu1 %vm694_vm3, %v1527_v6 }
 0x3d1   : > { %v2262_v48 = vpop.f32.mrf.mxu0 }
 0x3d2   : > { %v1529_v55 = vpack.c.bf16 %v2262_v48, %v2261_v9 }
 0x3d3   : > { %v1474_v35 = vpop.f32.mrf.mxu0 }
 0x3d4   : > { %v1528_v47 = vpack.c.bf16 %v1474_v35, %v1471_v33  ;;  %v2470_v35 = vld [vmem:[%s2599_s18 + $0x38] sm:$0xff] }
 0x3d5   : > { %v2265_v50 = vpop.f32.mrf.mxu0 }
 0x3d6   : > { %2293 = vmatprep.mubr.msk.bf16.mxu1 %vm694_vm3, %v1528_v47 }
 0x3d7   : > { %v1487_v11 = vpop.f32.mrf.mxu0  ;;  %2294 = vmatmul.mubr.msk.bf16.gmra.mxu1 %vm694_vm3, %v1529_v55 }
 0x3d9   : > { %v2266_v51 = vpop.f32.mrf.mxu0 }
 0x3da   : > { %v1531_v60 = vpack.c.bf16 %v2266_v51, %v2265_v50 }
 0x3db   : > { %v1490_v15 = vpop.f32.mrf.mxu0 }
 0x3dc   : > { %v1530_v46 = vpack.c.bf16 %v1490_v15, %v1487_v11  ;;  %v2471_v15 = vld [vmem:[%s2599_s18 + $0x28] sm:$0xff] }
 0x3dd   : > { %v2269_v31 = vpop.f32.mrf.mxu0 }
 0x3de   : > { %2297 = vmatprep.mubr.msk.bf16.mxu1 %vm694_vm3, %v1530_v46 }
 0x3df   : > { %v1503_v32 = vpop.f32.mrf.mxu0  ;;  %2298 = vmatmul.mubr.msk.bf16.gmra.mxu1 %vm694_vm3, %v1531_v60 }
 0x3e1   : > { %v2270_v37 = vpop.f32.mrf.mxu0 }
 0x3e2   : > { %v1533_v10 = vpack.c.bf16 %v2270_v37, %v2269_v31 }
 0x3e3   : > { %v1506_v52 = vpop.f32.mrf.mxu0 }
 0x3e4   : > { %v1532_v17 = vpack.c.bf16 %v1506_v52, %v1503_v32  ;;  %v2472_v52 = vld [vmem:[%s2599_s18 + $0x50] sm:$0xff] }
 0x3e6   : > { %2301 = vmatprep.mubr.msk.bf16.mxu1 %vm694_vm3, %v1532_v17 }
 0x3e7   : > { %2302 = vmatmul.mubr.msk.bf16.gmra.mxu1 %vm694_vm3, %v1533_v10 }
 0x46e   : > { %v2275_v59 = vpop.f32.mrf.mxu1 }
 0x46f   : > { %v1636_v0 = vadd.f32 %v2275_v59, %v3078_v58 }
 0x470   : > { %v1627_v2 = vpop.f32.mrf.mxu1 }
 0x471   : > { %v1763_v30 = vmul.f32 %v3083_v63, %v1636_v0  ;;  %v1628_v8 = vadd.f32 %v3078_v58, %v1627_v2 }
 0x472   : > { %v2276_v16 = vpop.f32.mrf.mxu1 }
 0x473   : > { %v1802_v36 = vadd.f32 %v3089_v7, %v1763_v30  ;;  %v1761_v22 = vmul.f32 %v3083_v63, %v1628_v8  ;;  %v1639_v44 = vadd.f32 %v2276_v16, %v3078_v58  ;;  %v2473_v30 = vld [vmem:[%s2599_s18 + $0x40] sm:$0xff] }
 0x474   : > { %v1630_v41 = vpop.f32.mrf.mxu1 }
 0x475   : > { %v1834_v57 = vadd.f32 %v2464_v5, %v1802_v36  ;;  %v1800_v24 = vadd.f32 %v3089_v7, %v1761_v22  ;;  %v1764_v29 = vmul.f32 %v3083_v63, %v1639_v44  ;;  %v1631_v43 = vadd.f32 %v3078_v58, %v1630_v41  ;;  %v2474_v41 = vld [vmem:[%s2599_s18 + $0x58] sm:$0xff] }
 0x477   : > { %1866 = vst.msk [vmem:[%s3101_s23 + $0x10] sm:$0xff] %vm463_vm1, %v1834_v57  ;;  %v1832_v62 = vadd.f32 %v2465_v14, %v1800_v24  ;;  %v1803_v12 = vadd.f32 %v3089_v7, %v1764_v29  ;;  %v1762_v20 = vmul.f32 %v3083_v63, %v1631_v43  ;;  %v2279_v38 = vpop.f32.mrf.mxu1  ;;  %v2475_v14 = vld [vmem:[%s2599_s18 + $0x48] sm:$0xff] }
 0x478   : > { %v1652_v28 = vadd.f32 %v2279_v38, %v3078_v58 }
 0x479   : > { %1864 = vst.msk [vmem:[%s3101_s23] sm:$0xff] %vm463_vm1, %v1832_v62  ;;  %v1835_v25 = vadd.f32 %v2466_v42, %v1803_v12  ;;  %v1801_v53 = vadd.f32 %v3089_v7, %v1762_v20  ;;  %v1643_v40 = vpop.f32.mrf.mxu1  ;;  %v2476_v42 = vld [vmem:[%s2599_s18 + $0x70] sm:$0xff] }
 0x47a   : > { %v1767_v54 = vmul.f32 %v3083_v63, %v1652_v28  ;;  %v1644_v21 = vadd.f32 %v3078_v58, %v1643_v40 }
 0x47b   : > { %1867 = vst.msk [vmem:[%s3101_s23 + $0x18] sm:$0xff] %vm463_vm1, %v1835_v25  ;;  %v1833_v61 = vadd.f32 %v2467_v45, %v1801_v53  ;;  %v2280_v23 = vpop.f32.mrf.mxu1  ;;  %v2477_v45 = vld [vmem:[%s2599_s18 + $0x60] sm:$0xff] }
 0x47c   : > { %v1806_v26 = vadd.f32 %v3089_v7, %v1767_v54  ;;  %v1765_v27 = vmul.f32 %v3083_v63, %v1644_v21  ;;  %v1655_v4 = vadd.f32 %v2280_v23, %v3078_v58 }
 0x47d   : > { %1865 = vst.msk [vmem:[%s3101_s23 + $0x8] sm:$0xff] %vm463_vm1, %v1833_v61  ;;  %v1646_v19 = vpop.f32.mrf.mxu1 }
 0x47e   : > { %v1838_v1 = vadd.f32 %v2468_v56, %v1806_v26  ;;  %v1804_v3 = vadd.f32 %v3089_v7, %v1765_v27  ;;  %v1768_v49 = vmul.f32 %v3083_v63, %v1655_v4  ;;  %v1647_v39 = vadd.f32 %v3078_v58, %v1646_v19  ;;  %v2478_v19 = vld [vmem:[%s2599_s18 + $0x78] sm:$0xff] }
 0x47f   : > { %v2283_v18 = vpop.f32.mrf.mxu1 }
 0x480   : > { %1870 = vst.msk [vmem:[%s3101_s23 + $0x30] sm:$0xff] %vm463_vm1, %v1838_v1  ;;  %v1836_v13 = vadd.f32 %v2469_v34, %v1804_v3  ;;  %v1807_v6 = vadd.f32 %v3089_v7, %v1768_v49  ;;  %v1766_v9 = vmul.f32 %v3083_v63, %v1647_v39  ;;  %v1668_v33 = vadd.f32 %v2283_v18, %v3078_v58  ;;  %v2479_v18 = vld [vmem:[%s2599_s18 + $0x68] sm:$0xff] }
 0x481   : > { %v1659_v48 = vpop.f32.mrf.mxu1 }
 0x482   : > { %1868 = vst.msk [vmem:[%s3101_s23 + $0x20] sm:$0xff] %vm463_vm1, %v1836_v13  ;;  %v1839_v47 = vadd.f32 %v2470_v35, %v1807_v6  ;;  %v1805_v55 = vadd.f32 %v3089_v7, %v1766_v9  ;;  %v1771_v50 = vmul.f32 %v3083_v63, %v1668_v33  ;;  %v1660_v11 = vadd.f32 %v3078_v58, %v1659_v48  ;;  %v2480_v48 = vld [vmem:[%s2599_s18 + $0x90] sm:$0xff] }
 0x483   : > { %v2284_v51 = vpop.f32.mrf.mxu1 }
 0x484   : > { %1871 = vst.msk [vmem:[%s3101_s23 + $0x38] sm:$0xff] %vm463_vm1, %v1839_v47  ;;  %v1837_v46 = vadd.f32 %v2471_v15, %v1805_v55  ;;  %v1810_v60 = vadd.f32 %v3089_v7, %v1771_v50  ;;  %v1769_v31 = vmul.f32 %v3083_v63, %v1660_v11  ;;  %v1671_v32 = vadd.f32 %v2284_v51, %v3078_v58  ;;  %v2481_v51 = vld [vmem:[%s2599_s18 + $0x80] sm:$0xff] }
 0x485   : > { %v1662_v37 = vpop.f32.mrf.mxu1 }
 0x486   : > { %1869 = vst.msk [vmem:[%s3101_s23 + $0x28] sm:$0xff] %vm463_vm1, %v1837_v46  ;;  %v1842_v17 = vadd.f32 %v2472_v52, %v1810_v60  ;;  %v1808_v10 = vadd.f32 %v3089_v7, %v1769_v31  ;;  %v1772_v59 = vmul.f32 %v3083_v63, %v1671_v32  ;;  %v1663_v0 = vadd.f32 %v3078_v58, %v1662_v37  ;;  %v2482_v37 = vld [vmem:[%s2599_s18 + $0x98] sm:$0xff] }
 0x487   : > { %v2287_v2 = vpop.f32.mrf.mxu1 }
 0x488   : > { %1874 = vst.msk [vmem:[%s3101_s23 + $0x50] sm:$0xff] %vm463_vm1, %v1842_v17  ;;  %v1840_v8 = vadd.f32 %v2473_v30, %v1808_v10  ;;  %v1811_v16 = vadd.f32 %v3089_v7, %v1772_v59  ;;  %v1770_v36 = vmul.f32 %v3083_v63, %v1663_v0  ;;  %v1684_v22 = vadd.f32 %v2287_v2, %v3078_v58  ;;  %v2483_v2 = vld [vmem:[%s2599_s18 + $0x88] sm:$0xff] }
 0x489   : > { %v1675_v44 = vpop.f32.mrf.mxu1 }
 0x48a   : > { %1872 = vst.msk [vmem:[%s3101_s23 + $0x40] sm:$0xff] %vm463_vm1, %v1840_v8  ;;  %v1843_v5 = vadd.f32 %v2474_v41, %v1811_v16  ;;  %v1809_v57 = vadd.f32 %v3089_v7, %v1770_v36  ;;  %v1775_v24 = vmul.f32 %v3083_v63, %v1684_v22  ;;  %v1676_v29 = vadd.f32 %v3078_v58, %v1675_v44  ;;  %v2484_v44 = vld [vmem:[%s2599_s18 + $0xb0] sm:$0xff] }
 0x48b   : > { %v2288_v43 = vpop.f32.mrf.mxu1 }
 0x48c   : > { %1875 = vst.msk [vmem:[%s3101_s23 + $0x58] sm:$0xff] %vm463_vm1, %v1843_v5  ;;  %v1841_v62 = vadd.f32 %v2475_v14, %v1809_v57  ;;  %v1814_v12 = vadd.f32 %v3089_v7, %v1775_v24  ;;  %v1773_v20 = vmul.f32 %v3083_v63, %v1676_v29  ;;  %v1687_v38 = vadd.f32 %v2288_v43, %v3078_v58  ;;  %v2485_v43 = vld [vmem:[%s2599_s18 + $0xa0] sm:$0xff] }
 0x48d   : > { %v1678_v28 = vpop.f32.mrf.mxu1 }
 0x48e   : > { %1873 = vst.msk [vmem:[%s3101_s23 + $0x48] sm:$0xff] %vm463_vm1, %v1841_v62  ;;  %v1846_v25 = vadd.f32 %v2476_v42, %v1814_v12  ;;  %v1812_v53 = vadd.f32 %v3089_v7, %v1773_v20  ;;  %v1776_v40 = vmul.f32 %v3083_v63, %v1687_v38  ;;  %v1679_v54 = vadd.f32 %v3078_v58, %v1678_v28  ;;  %v2486_v28 = vld [vmem:[%s2599_s18 + $0xb8] sm:$0xff] }
 0x48f   : > { %v2291_v21 = vpop.f32.mrf.mxu1 }
 0x490   : > { %1878 = vst.msk [vmem:[%s3101_s23 + $0x70] sm:$0xff] %vm463_vm1, %v1846_v25  ;;  %v1844_v61 = vadd.f32 %v2477_v45, %v1812_v53  ;;  %v1815_v23 = vadd.f32 %v3089_v7, %v1776_v40  ;;  %v1774_v26 = vmul.f32 %v3083_v63, %v1679_v54  ;;  %v1700_v27 = vadd.f32 %v2291_v21, %v3078_v58  ;;  %v2487_v21 = vld [vmem:[%s2599_s18 + $0xa8] sm:$0xff] }
 0x491   : > { %v1691_v4 = vpop.f32.mrf.mxu1 }
 0x492   : > { %1876 = vst.msk [vmem:[%s3101_s23 + $0x60] sm:$0xff] %vm463_vm1, %v1844_v61  ;;  %v1847_v56 = vadd.f32 %v2478_v19, %v1815_v23  ;;  %v1813_v1 = vadd.f32 %v3089_v7, %v1774_v26  ;;  %v1779_v3 = vmul.f32 %v3083_v63, %v1700_v27  ;;  %v1692_v49 = vadd.f32 %v3078_v58, %v1691_v4  ;;  %v2488_v4 = vld [vmem:[%s2599_s18 + $0xd0] sm:$0xff] }
 0x493   : > { %v2292_v39 = vpop.f32.mrf.mxu1 }
 0x494   : > { %1879 = vst.msk [vmem:[%s3101_s23 + $0x78] sm:$0xff] %vm463_vm1, %v1847_v56  ;;  %v1845_v34 = vadd.f32 %v2479_v18, %v1813_v1  ;;  %v1818_v13 = vadd.f32 %v3089_v7, %v1779_v3  ;;  %v1777_v6 = vmul.f32 %v3083_v63, %v1692_v49  ;;  %v1703_v9 = vadd.f32 %v2292_v39, %v3078_v58  ;;  %v2489_v39 = vld [vmem:[%s2599_s18 + $0xc0] sm:$0xff] }
 0x495   : > { %v1694_v33 = vpop.f32.mrf.mxu1 }
 0x496   : > { %1877 = vst.msk [vmem:[%s3101_s23 + $0x68] sm:$0xff] %vm463_vm1, %v1845_v34  ;;  %v1850_v35 = vadd.f32 %v2480_v48, %v1818_v13  ;;  %v1816_v47 = vadd.f32 %v3089_v7, %v1777_v6  ;;  %v1780_v55 = vmul.f32 %v3083_v63, %v1703_v9  ;;  %v1695_v50 = vadd.f32 %v3078_v58, %v1694_v33  ;;  %v2490_v33 = vld [vmem:[%s2599_s18 + $0xd8] sm:$0xff] }
 0x497   : > { %v2295_v11 = vpop.f32.mrf.mxu1 }
 0x498   : > { %1882 = vst.msk [vmem:[%s3101_s23 + $0x90] sm:$0xff] %vm463_vm1, %v1850_v35  ;;  %v1848_v15 = vadd.f32 %v2481_v51, %v1816_v47  ;;  %v1819_v46 = vadd.f32 %v3089_v7, %v1780_v55  ;;  %v1778_v60 = vmul.f32 %v3083_v63, %v1695_v50  ;;  %v1716_v31 = vadd.f32 %v2295_v11, %v3078_v58  ;;  %v2491_v11 = vld [vmem:[%s2599_s18 + $0xc8] sm:$0xff] }
 0x499   : > { %v1707_v32 = vpop.f32.mrf.mxu1 }
 0x49a   : > { %1880 = vst.msk [vmem:[%s3101_s23 + $0x80] sm:$0xff] %vm463_vm1, %v1848_v15  ;;  %v1851_v52 = vadd.f32 %v2482_v37, %v1819_v46  ;;  %v1817_v17 = vadd.f32 %v3089_v7, %v1778_v60  ;;  %v1783_v10 = vmul.f32 %v3083_v63, %v1716_v31  ;;  %v1708_v59 = vadd.f32 %v3078_v58, %v1707_v32  ;;  %v2492_v32 = vld [vmem:[%s2599_s18 + $0xf0] sm:$0xff] }
 0x49b   : > { %v2296_v0 = vpop.f32.mrf.mxu1 }
 0x49c   : > { %1883 = vst.msk [vmem:[%s3101_s23 + $0x98] sm:$0xff] %vm463_vm1, %v1851_v52  ;;  %v1849_v30 = vadd.f32 %v2483_v2, %v1817_v17  ;;  %v1822_v8 = vadd.f32 %v3089_v7, %v1783_v10  ;;  %v1781_v16 = vmul.f32 %v3083_v63, %v1708_v59  ;;  %v1719_v36 = vadd.f32 %v2296_v0, %v3078_v58  ;;  %v2493_v59 = vld [vmem:[%s2599_s18 + $0xe0] sm:$0xff] }
 0x49d   : > { %v1710_v22 = vpop.f32.mrf.mxu1 }
 0x49e   : > { %1881 = vst.msk [vmem:[%s3101_s23 + $0x88] sm:$0xff] %vm463_vm1, %v1849_v30  ;;  %v1854_v41 = vadd.f32 %v2484_v44, %v1822_v8  ;;  %v1820_v5 = vadd.f32 %v3089_v7, %v1781_v16  ;;  %v1784_v57 = vmul.f32 %v3083_v63, %v1719_v36  ;;  %v1711_v24 = vadd.f32 %v3078_v58, %v1710_v22  ;;  %v2494_v8 = vld [vmem:[%s2599_s18 + $0xf8] sm:$0xff]  ;;  %v2495_v22 = vld [vmem:[%s2599_s18 + $0xe8] sm:$0xff] }
 0x49f   : > { %v2299_v29 = vpop.f32.mrf.mxu1 }
 0x4a0   : > { %1886 = vst.msk [vmem:[%s3101_s23 + $0xb0] sm:$0xff] %vm463_vm1, %v1854_v41  ;;  %v1852_v14 = vadd.f32 %v2485_v43, %v1820_v5  ;;  %v1823_v62 = vadd.f32 %v3089_v7, %v1784_v57  ;;  %v1782_v12 = vmul.f32 %v3083_v63, %v1711_v24  ;;  %v1732_v20 = vadd.f32 %v2299_v29, %v3078_v58 }
 0x4a1   : > { %v1723_v38 = vpop.f32.mrf.mxu1 }
 0x4a2   : > { %1884 = vst.msk [vmem:[%s3101_s23 + $0xa0] sm:$0xff] %vm463_vm1, %v1852_v14  ;;  %v1855_v42 = vadd.f32 %v2486_v28, %v1823_v62  ;;  %v1821_v25 = vadd.f32 %v3089_v7, %v1782_v12  ;;  %v1787_v53 = vmul.f32 %v3083_v63, %v1732_v20  ;;  %v1724_v40 = vadd.f32 %v3078_v58, %v1723_v38 }
 0x4a3   : > { %v2300_v54 = vpop.f32.mrf.mxu1 }
 0x4a4   : > { %1887 = vst.msk [vmem:[%s3101_s23 + $0xb8] sm:$0xff] %vm463_vm1, %v1855_v42  ;;  %v1853_v45 = vadd.f32 %v2487_v21, %v1821_v25  ;;  %v1826_v61 = vadd.f32 %v3089_v7, %v1787_v53  ;;  %v1785_v23 = vmul.f32 %v3083_v63, %v1724_v40  ;;  %v1735_v26 = vadd.f32 %v2300_v54, %v3078_v58 }
 0x4a5   : > { %v1726_v27 = vpop.f32.mrf.mxu1 }
 0x4a6   : > { %1885 = vst.msk [vmem:[%s3101_s23 + $0xa8] sm:$0xff] %vm463_vm1, %v1853_v45  ;;  %v1858_v19 = vadd.f32 %v2488_v4, %v1826_v61  ;;  %v1824_v56 = vadd.f32 %v3089_v7, %v1785_v23  ;;  %v1788_v1 = vmul.f32 %v3083_v63, %v1735_v26  ;;  %v1727_v3 = vadd.f32 %v3078_v58, %v1726_v27 }
 0x4a7   : > { %v2303_v49 = vpop.f32.mrf.mxu1 }
 0x4a8   : > { %1890 = vst.msk [vmem:[%s3101_s23 + $0xd0] sm:$0xff] %vm463_vm1, %v1858_v19  ;;  %v1856_v18 = vadd.f32 %v2489_v39, %v1824_v56  ;;  %v1827_v34 = vadd.f32 %v3089_v7, %v1788_v1  ;;  %v1786_v13 = vmul.f32 %v3083_v63, %v1727_v3  ;;  %v1748_v6 = vadd.f32 %v2303_v49, %v3078_v58 }
 0x4a9   : > { %v1739_v9 = vpop.f32.mrf.mxu1 }
 0x4aa   : > { %1888 = vst.msk [vmem:[%s3101_s23 + $0xc0] sm:$0xff] %vm463_vm1, %v1856_v18  ;;  %v1859_v48 = vadd.f32 %v2490_v33, %v1827_v34  ;;  %v1825_v35 = vadd.f32 %v3089_v7, %v1786_v13  ;;  %v1791_v47 = vmul.f32 %v3083_v63, %v1748_v6  ;;  %v1740_v55 = vadd.f32 %v3078_v58, %v1739_v9 }
 0x4ab   : > { %v2304_v50 = vpop.f32.mrf.mxu1 }
 0x4ac   : > { %1891 = vst.msk [vmem:[%s3101_s23 + $0xd8] sm:$0xff] %vm463_vm1, %v1859_v48  ;;  %v1857_v51 = vadd.f32 %v2491_v11, %v1825_v35  ;;  %v1830_v15 = vadd.f32 %v3089_v7, %v1791_v47  ;;  %v1789_v46 = vmul.f32 %v3083_v63, %v1740_v55  ;;  %v1751_v60 = vadd.f32 %v2304_v50, %v3078_v58 }
 0x4ad   : > { %v1742_v31 = vpop.f32.mrf.mxu1 }
 0x4ae   : > { %1889 = vst.msk [vmem:[%s3101_s23 + $0xc8] sm:$0xff] %vm463_vm1, %v1857_v51  ;;  %v1862_v37 = vadd.f32 %v2492_v32, %v1830_v15  ;;  %v1828_v52 = vadd.f32 %v3089_v7, %v1789_v46  ;;  %v1792_v17 = vmul.f32 %v3083_v63, %v1751_v60  ;;  %v1743_v10 = vadd.f32 %v3078_v58, %v1742_v31 }
 0x4b0   : > { %1894 = vst.msk [vmem:[%s3101_s23 + $0xf0] sm:$0xff] %vm463_vm1, %v1862_v37  ;;  %v1860_v0 = vadd.f32 %v2493_v59, %v1828_v52  ;;  %v1831_v2 = vadd.f32 %v3089_v7, %v1792_v17  ;;  %v1790_v30 = vmul.f32 %v3083_v63, %v1743_v10 }
 0x4b2   : > { %1892 = vst.msk [vmem:[%s3101_s23 + $0xe0] sm:$0xff] %vm463_vm1, %v1860_v0  ;;  %v1863_v16 = vadd.f32 %v2494_v8, %v1831_v2  ;;  %v1829_v36 = vadd.f32 %v3089_v7, %v1790_v30 }
 0x4b4   : > { %1895 = vst.msk [vmem:[%s3101_s23 + $0xf8] sm:$0xff] %vm463_vm1, %v1863_v16  ;;  %v1861_v44 = vadd.f32 %v2495_v22, %v1829_v36 }
 0x4b6   : > { %1893 = vst.msk [vmem:[%s3101_s23 + $0xe8] sm:$0xff] %vm463_vm1, %v1861_v44 }
 0x4b7 PF: > { %s19_s11 = sadd.s32 1, %s2518_s11   ;;  %s3308_s30 = smov %s2514_s10 }
 0x4b8   : > { %p16_p5 = scmp.ge.s32.totalorder %s19_s11, 4   ;;  %s3309_s10 = smov %s3311_s12 }
 0x4ba   :  { %18 = sbr.rel (!%p16_p5) target bundleno = 2 (0x2), region = 92 }

</bundles_post_ra>
